<compile_context>
chip_gen: v6e
topology: v6e:2x2x1
jax: 0.10.0
libtpu: 0.0.40
codegen_flags: <defaults>
</compile_context>

<pallas_src>
import functools

import jax
import jax.numpy as jnp
from jax.experimental import pallas as pl
from jax.experimental.pallas import tpu as pltpu


# ----------------------------------------------------------------------------
# Kernel 1: fused K|Q|V 1x1 convolution for all four horizontal blocks.
# ----------------------------------------------------------------------------
def _kqv_fused_kernel(x_ref, w_ref, b_ref, y_ref):
    # x_ref: (1, C,  Tn)   input pixels for one spatial tile (lanes = spatial)
    # w_ref: (1, Co, C)    fused [Wk; Wq; Wv] of the current horizontal block
    # b_ref: (1, Co, 1)    fused bias (kept f32)
    # y_ref: (1, Co, Tn)   fused K|Q|V output tile (single lane-dense store)
    y = jnp.dot(w_ref[0], x_ref[0], preferred_element_type=jnp.float32)
    y_ref[0] = (y + b_ref[0]).astype(y_ref.dtype)


def _pick_tile(n, cap):
    """Largest multiple of 128 that divides n and is <= cap (else n itself)."""
    if n % 128 != 0:
        return n
    t = max(128, (min(n, cap) // 128) * 128)
    while n % t:
        t -= 128
    return t


def _kqv_fused_conv(x, w_fused, b_fused, *, compute_dtype=None, tile_cap=1024):
    """All-block fused 1x1 conv, NCHW-native.

    Returns y of shape (B, Co, H*W) with
      y[:, :, i*Hb*W:(i+1)*Hb*W] = w_fused[i] @ x_block_i + b_fused[i].
    """
    B, C, H, W = x.shape
    n_blocks, Co, _ = w_fused.shape
    Hb = H // n_blocks
    Npb = Hb * W                       # spatial extent of one horizontal block

    x2 = x.reshape(B, C, H * W)        # free reshape: no transpose, no pad
    wf = w_fused
    if compute_dtype is not None:      # optional bf16 operands (v6e/v7x MXU)
        x2 = x2.astype(compute_dtype)
        wf = wf.astype(compute_dtype)

    tn = _pick_tile(Npb, tile_cap)     # lane-dense spatial tile
    bpb = Npb // tn                    # spatial tiles per horizontal block
    grid = (n_blocks, B, bpb)          # spatial innermost: weights stay put

    itemsize = x2.dtype.itemsize
    cost = pl.CostEstimate(
        flops=2 * B * H * W * C * Co,
        transcendentals=0,
        bytes_accessed=(B * C * H * W * itemsize          # x
                        + B * Co * H * W * 4              # fused output
                        + wf.size * itemsize + b_fused.size * 4),
    )

    return pl.pallas_call(
        _kqv_fused_kernel,
        out_shape=jax.ShapeDtypeStruct((B, Co, H * W), jnp.float32),
        grid_spec=pltpu.PrefetchScalarGridSpec(
            num_scalar_prefetch=0,
            grid=grid,
            in_specs=[
                pl.BlockSpec((1, C, tn), lambda g, b, t: (b, 0, g * bpb + t)),
                # Grid-invariant per-block weights/bias; tiny vs. the row
                # tiles, so default buffering leaves plenty of VMEM headroom.
                pl.BlockSpec((1, Co, C), lambda g, b, t: (g, 0, 0)),
                pl.BlockSpec((1, Co, 1), lambda g, b, t: (g, 0, 0)),
            ],
            out_specs=pl.BlockSpec((1, Co, tn),
                                   lambda g, b, t: (b, 0, g * bpb + t)),
        ),
        compiler_params=pltpu.CompilerParams(
            dimension_semantics=("parallel", "parallel", "parallel"),
            vmem_limit_bytes=64 * 1024 * 1024,
        ),
        cost_estimate=cost,
    )(x2, wf, b_fused)


# ----------------------------------------------------------------------------
# Kernel 2: pooled segment attention (one batch element per grid step).
# ----------------------------------------------------------------------------
def _hsa_attn_kernel(q_ref, kt_ref, v_ref, o_ref):
    # q_ref : (1, Ck, Nq)   queries of the paired block (channels x spatial)
    # kt_ref: (1, Nk, Ck)   pooled keys, pre-transposed in the wrapper
    # v_ref : (1, C,  Nk)   pooled values
    # o_ref : (1, C,  Nq)   lane-dense output
    q = q_ref[0]
    kt = kt_ref[0]
    v = v_ref[0]
    # scores^T: s[m, n] = sum_c K[c, m] * Q[c, n]   -> (Nk, Nq)
    s = jnp.dot(kt, q, preferred_element_type=jnp.float32)
    # torch: softmax(Q@K, dim=1) then permute == normalize over the query axis
    s = s - jnp.max(s, axis=1, keepdims=True)
    e = jnp.exp(s)
    p = e / jnp.sum(e, axis=1, keepdims=True)
    # out = V_pooled @ attention^T  -> (C, Nq)
    o_ref[0] = jnp.dot(v, p, preferred_element_type=jnp.float32).astype(o_ref.dtype)


def _segment_attention(q, kt, v):
    # TODO(synk): tile Nq with a two-pass / online softmax for very large
    # feature maps; here Nq = (H/4)*W and all operands fit VMEM comfortably.
    B, Ck, Nq = q.shape
    Nk = kt.shape[1]
    C = v.shape[1]
    return pl.pallas_call(
        _hsa_attn_kernel,
        out_shape=jax.ShapeDtypeStruct((B, C, Nq), jnp.float32),
        grid_spec=pltpu.PrefetchScalarGridSpec(
            num_scalar_prefetch=0,
            grid=(B,),
            in_specs=[
                pl.BlockSpec((1, Ck, Nq), lambda b: (b, 0, 0)),
                pl.BlockSpec((1, Nk, Ck), lambda b: (b, 0, 0)),
                pl.BlockSpec((1, C, Nk), lambda b: (b, 0, 0)),
            ],
            out_specs=pl.BlockSpec((1, C, Nq), lambda b: (b, 0, 0)),
        ),
        compiler_params=pltpu.CompilerParams(
            dimension_semantics=("parallel",),
            vmem_limit_bytes=64 * 1024 * 1024,
        ),
    )(q, kt, v)


# ----------------------------------------------------------------------------
# Wrapper: full HSA_model forward.
# ----------------------------------------------------------------------------
def _avg_pool_nchw(x, kh, kw):
    """nn.AvgPool2d with kernel == stride (the only case selfAttention uses)."""
    B, C, H, W = x.shape
    Ho, Wo = H // kh, W // kw
    x = x[:, :, :Ho * kh, :Wo * kw]
    return jnp.mean(x.reshape(B, C, Ho, kh, Wo, kw), axis=(3, 5))


_SCALES = (1, 2, 4, 8)


@functools.partial(jax.jit, static_argnames=("compute_dtype", "tile_cap"))
def hsa_forward(x, w_fused, b_fused, *, compute_dtype=None, tile_cap=1024):
    """HSA_model.forward.

    w_fused: (4, Co, C) with Co = 2*(C//8) + C, rows laid out as
             [conv_k ; conv_q ; conv_v] for each horizontal block.
    b_fused: (4, Co, 1) matching biases.
    """
    B, C, H, W = x.shape
    Ck = C // 8
    Hb = H // 4
    Npb = Hb * W

    # Fused K|Q|V for all 4 horizontal blocks in a single Pallas call.
    y = _kqv_fused_conv(x, w_fused, b_fused,
                        compute_dtype=compute_dtype, tile_cap=tile_cap)

    outs = []
    for i in range(4):
        s = _SCALES[i]
        seg = y[:, :, i * Npb:(i + 1) * Npb]                   # block i's K|Q|V
        j = (i + 1) % 4
        qseg = y[:, :, j * Npb:(j + 1) * Npb]                  # paired block's Q
        k4 = seg[:, :Ck, :].reshape(B, Ck, Hb, W)
        v4 = seg[:, 2 * Ck:, :].reshape(B, C, Hb, W)
        q = qseg[:, Ck:2 * Ck, :]                              # (B, Ck, Nq)
        kp = _avg_pool_nchw(k4, s, 4 * s)                      # (B, Ck, Hk, Wk)
        vp = _avg_pool_nchw(v4, s, 4 * s)                      # (B, C,  Hk, Wk)
        nk = kp.shape[2] * kp.shape[3]
        kt = jnp.transpose(kp.reshape(B, Ck, nk), (0, 2, 1))   # (B, Nk, Ck)
        o = _segment_attention(q, kt, vp.reshape(B, C, nk))    # (B, C, Nq)
        outs.append(o.reshape(B, C, Hb, W))
    return jnp.concatenate(outs, axis=2)


# ----------------------------------------------------------------------------
# Pure-JAX reference (direct transcription of the PyTorch module).
# ----------------------------------------------------------------------------
@jax.jit
def _reference_forward(x, w_fused, b_fused):
    B, C, H, W = x.shape
    Ck = C // 8
    Hb = H // 4
    Ks, Qs, Vs = [], [], []
    for i in range(4):
        blk = x[:, :, i * Hb:(i + 1) * Hb, :]
        y = (jnp.einsum("oc,bchw->bohw", w_fused[i], blk)
             + b_fused[i, :, 0][None, :, None, None])
        Ks.append(y[:, :Ck])
        Qs.append(y[:, Ck:2 * Ck])
        Vs.append(y[:, 2 * Ck:])
    outs = []
    for i in range(4):
        s = _SCALES[i]
        Q = Qs[(i + 1) % 4]
        Kp = _avg_pool_nchw(Ks[i], s, 4 * s)
        Vp = _avg_pool_nchw(Vs[i], s, 4 * s)
        hq, wq = Q.shape[2], Q.shape[3]
        nq, nk = hq * wq, Kp.shape[2] * Kp.shape[3]
        Qp = jnp.transpose(Q.reshape(B, Ck, nq), (0, 2, 1))    # (B, nq, Ck)
        Kf = Kp.reshape(B, Ck, nk)
        Vf = Vp.reshape(B, C, nk)
        att = jax.nn.softmax(jnp.einsum("bqc,bck->bqk", Qp, Kf), axis=1)
        out = jnp.einsum("bck,bkq->bcq", Vf, jnp.transpose(att, (0, 2, 1)))
        outs.append(out.reshape(B, C, hq, wq))
    return jnp.concatenate(outs, axis=2)


if __name__ == "__main__":
    # Smallest shapes consistent with the module: channels divisible by 8 and
    # (H//4, W) at least the scale-8 pool kernel (8, 32)  ->  H = W = 32.
    B, C, H, W = 2, 32, 32, 32
    Ck = C // 8
    Co = 2 * Ck + C

    key = jax.random.PRNGKey(0)
    kx, kw, kb = jax.random.split(key, 3)
    x = jax.random.normal(kx, (B, C, H, W), dtype=jnp.float32)
    # Per-horizontal-block fused 1x1-conv parameters ([Wk; Wq; Wv] rows).
    w_fused = 0.1 * jax.random.normal(kw, (4, Co, C), dtype=jnp.float32)
    b_fused = 0.1 * jax.random.normal(kb, (4, Co, 1), dtype=jnp.float32)

    out = hsa_forward(x, w_fused, b_fused)
    jax.block_until_ready(out)

    ref = _reference_forward(x, w_fused, b_fused)
    assert out.shape == (B, C, H, W), out.shape
    max_err = float(jnp.max(jnp.abs(out - ref)))
    assert jnp.allclose(out, ref, atol=1e-3, rtol=1e-3), max_err

    print("KERNEL_OK")
</pallas_src>

<mosaic_0001>
module attributes {stable_mosaic.version = 11 : i64} {
  func.func @_kqv_fused_kernel(%arg0: i32, %arg1: i32, %arg2: i32, %arg3: memref<1x32x256xf32, #tpu.memory_space<vmem>>, %arg4: memref<1x40x32xf32, #tpu.memory_space<vmem>>, %arg5: memref<1x40x1xf32, #tpu.memory_space<vmem>>, %arg6: memref<1x40x256xf32, #tpu.memory_space<vmem>>) attributes {dimension_semantics = [#tpu.dimension_semantics<parallel>, #tpu.dimension_semantics<parallel>, #tpu.dimension_semantics<parallel>], iteration_bounds = array<i64: 4, 2, 1>, scalar_prefetch = 0 : i64, scratch_operands = 0 : i64, tpu.core_type = #tpu.core_type<tc>, window_params = [{transform_indices = @transform_0, window_bounds = array<i64: 1, 32, 256>}, {transform_indices = @transform_1, window_bounds = array<i64: 1, 40, 32>}, {transform_indices = @transform_2, window_bounds = array<i64: 1, 40, 1>}, {transform_indices = @transform_3, window_bounds = array<i64: 1, 40, 256>}]} {
    %c0 = arith.constant 0 : index
    %c0_0 = arith.constant 0 : index
    %c0_1 = arith.constant 0 : index
    %0 = vector.load %arg4[%c0, %c0_0, %c0_1] : memref<1x40x32xf32, #tpu.memory_space<vmem>>, vector<1x40x32xf32>
    %1 = vector.shape_cast %0 : vector<1x40x32xf32> to vector<40x32xf32>
    %c0_2 = arith.constant 0 : index
    %c0_3 = arith.constant 0 : index
    %c0_4 = arith.constant 0 : index
    %2 = vector.load %arg3[%c0_2, %c0_3, %c0_4] : memref<1x32x256xf32, #tpu.memory_space<vmem>>, vector<1x32x256xf32>
    %3 = vector.shape_cast %2 : vector<1x32x256xf32> to vector<32x256xf32>
    %cst = arith.constant dense<0.000000e+00> : vector<40x256xf32>
    %4 = tpu.matmul %1, %3, %cst {dimension_numbers = #tpu.dot_dimension_numbers<[1], [0], [0], [1], [0, 0, 1, 1], [], []>} : vector<40x32xf32>, vector<32x256xf32>, vector<40x256xf32> -> vector<40x256xf32>
    %c0_5 = arith.constant 0 : index
    %c0_6 = arith.constant 0 : index
    %c0_7 = arith.constant 0 : index
    %5 = vector.load %arg5[%c0_5, %c0_6, %c0_7] : memref<1x40x1xf32, #tpu.memory_space<vmem>>, vector<1x40x1xf32>
    %6 = vector.shape_cast %5 : vector<1x40x1xf32> to vector<40x1xf32>
    %7 = vector.broadcast %6 : vector<40x1xf32> to vector<40x256xf32>
    %8 = arith.addf %4, %7 : vector<40x256xf32>
    %c0_8 = arith.constant 0 : index
    %c0_9 = arith.constant 0 : index
    %c0_10 = arith.constant 0 : index
    %9 = vector.load %arg6[%c0_8, %c0_9, %c0_10] : memref<1x40x256xf32, #tpu.memory_space<vmem>>, vector<1x40x256xf32>
    %10 = vector.shape_cast %9 : vector<1x40x256xf32> to vector<40x256xf32>
    %11 = vector.shape_cast %8 : vector<40x256xf32> to vector<1x40x256xf32>
    tpu.vector_store %arg6[%c0_8, %c0_9, %c0_10], %11 {strides = array<i32>} : memref<1x40x256xf32, #tpu.memory_space<vmem>>, vector<1x40x256xf32>,
    return
  }
  func.func @transform_0(%arg0: i32, %arg1: i32, %arg2: i32) -> (i32, i32, i32) {
    %c1_i32 = arith.constant 1 : i32
    %0 = arith.muli %arg0, %c1_i32 : i32
    %1 = arith.addi %0, %arg2 : i32
    %c0_i32 = arith.constant 0 : i32
    %c0_i32_0 = arith.constant 0 : i32
    return %arg1, %c0_i32, %1 : i32, i32, i32
  }
  func.func @transform_1(%arg0: i32, %arg1: i32, %arg2: i32) -> (i32, i32, i32) {
    %c0_i32 = arith.constant 0 : i32
    %c0_i32_0 = arith.constant 0 : i32
    %c0_i32_1 = arith.constant 0 : i32
    return %arg0, %c0_i32, %c0_i32_0 : i32, i32, i32
  }
  func.func @transform_2(%arg0: i32, %arg1: i32, %arg2: i32) -> (i32, i32, i32) {
    %c0_i32 = arith.constant 0 : i32
    %c0_i32_0 = arith.constant 0 : i32
    %c0_i32_1 = arith.constant 0 : i32
    return %arg0, %c0_i32, %c0_i32_0 : i32, i32, i32
  }
  func.func @transform_3(%arg0: i32, %arg1: i32, %arg2: i32) -> (i32, i32, i32) {
    %c1_i32 = arith.constant 1 : i32
    %0 = arith.muli %arg0, %c1_i32 : i32
    %1 = arith.addi %0, %arg2 : i32
    %c0_i32 = arith.constant 0 : i32
    %c0_i32_0 = arith.constant 0 : i32
    return %arg1, %c0_i32, %1 : i32, i32, i32
  }
}

module attributes {stable_mosaic.version = 11 : i64} {
  func.func @_hsa_attn_kernel(%arg0: i32, %arg1: memref<1x4x256xf32, #tpu.memory_space<vmem>>, %arg2: memref<1x1x4xf32, #tpu.memory_space<vmem>>, %arg3: memref<1x32x1xf32, #tpu.memory_space<vmem>>, %arg4: memref<1x32x256xf32, #tpu.memory_space<vmem>>) attributes {dimension_semantics = [#tpu.dimension_semantics<parallel>], iteration_bounds = array<i64: 2>, scalar_prefetch = 0 : i64, scratch_operands = 0 : i64, tpu.core_type = #tpu.core_type<tc>, window_params = [{transform_indices = @transform_0, window_bounds = array<i64: 1, 4, 256>}, {transform_indices = @transform_1, window_bounds = array<i64: 1, 1, 4>}, {transform_indices = @transform_2, window_bounds = array<i64: 1, 32, 1>}, {transform_indices = @transform_3, window_bounds = array<i64: 1, 32, 256>}]} {
    %c0 = arith.constant 0 : index
    %c0_0 = arith.constant 0 : index
    %c0_1 = arith.constant 0 : index
    %0 = vector.load %arg1[%c0, %c0_0, %c0_1] : memref<1x4x256xf32, #tpu.memory_space<vmem>>, vector<1x4x256xf32>
    %1 = vector.shape_cast %0 : vector<1x4x256xf32> to vector<4x256xf32>
    %c0_2 = arith.constant 0 : index
    %c0_3 = arith.constant 0 : index
    %c0_4 = arith.constant 0 : index
    %2 = vector.load %arg2[%c0_2, %c0_3, %c0_4] : memref<1x1x4xf32, #tpu.memory_space<vmem>>, vector<1x1x4xf32>
    %3 = vector.shape_cast %2 : vector<1x1x4xf32> to vector<1x4xf32>
    %c0_5 = arith.constant 0 : index
    %c0_6 = arith.constant 0 : index
    %c0_7 = arith.constant 0 : index
    %4 = vector.load %arg3[%c0_5, %c0_6, %c0_7] : memref<1x32x1xf32, #tpu.memory_space<vmem>>, vector<1x32x1xf32>
    %5 = vector.shape_cast %4 : vector<1x32x1xf32> to vector<32x1xf32>
    %cst = arith.constant dense<0.000000e+00> : vector<1x256xf32>
    %6 = tpu.matmul %3, %1, %cst {dimension_numbers = #tpu.dot_dimension_numbers<[1], [0], [0], [1], [0, 0, 1, 1], [], []>} : vector<1x4xf32>, vector<4x256xf32>, vector<1x256xf32> -> vector<1x256xf32>
    %cst_8 = arith.constant dense<0xFF800000> : vector<1xf32>
    %7 = vector.multi_reduction <maximumf>, %6, %cst_8 [1] : vector<1x256xf32> to vector<1xf32>
    %8 = vector.shape_cast %7 : vector<1xf32> to vector<1x1xf32>
    %9 = vector.broadcast %8 : vector<1x1xf32> to vector<1x256xf32>
    %10 = arith.subf %6, %9 : vector<1x256xf32>
    %11 = math.exp %10 : vector<1x256xf32>
    %cst_9 = arith.constant dense<0.000000e+00> : vector<1xf32>
    %12 = vector.multi_reduction <add>, %11, %cst_9 [1] : vector<1x256xf32> to vector<1xf32>
    %13 = vector.shape_cast %12 : vector<1xf32> to vector<1x1xf32>
    %14 = vector.broadcast %13 : vector<1x1xf32> to vector<1x256xf32>
    %15 = arith.divf %11, %14 : vector<1x256xf32>
    %cst_10 = arith.constant dense<0.000000e+00> : vector<32x256xf32>
    %16 = tpu.matmul %5, %15, %cst_10 {dimension_numbers = #tpu.dot_dimension_numbers<[1], [0], [0], [1], [0, 0, 1, 1], [], []>} : vector<32x1xf32>, vector<1x256xf32>, vector<32x256xf32> -> vector<32x256xf32>
    %c0_11 = arith.constant 0 : index
    %c0_12 = arith.constant 0 : index
    %c0_13 = arith.constant 0 : index
    %17 = vector.load %arg4[%c0_11, %c0_12, %c0_13] : memref<1x32x256xf32, #tpu.memory_space<vmem>>, vector<1x32x256xf32>
    %18 = vector.shape_cast %17 : vector<1x32x256xf32> to vector<32x256xf32>
    %19 = vector.shape_cast %16 : vector<32x256xf32> to vector<1x32x256xf32>
    tpu.vector_store %arg4[%c0_11, %c0_12, %c0_13], %19 {strides = array<i32>} : memref<1x32x256xf32, #tpu.memory_space<vmem>>, vector<1x32x256xf32>,
    return
  }
  func.func @transform_0(%arg0: i32) -> (i32, i32, i32) {
    %c0_i32 = arith.constant 0 : i32
    %c0_i32_0 = arith.constant 0 : i32
    %c0_i32_1 = arith.constant 0 : i32
    return %arg0, %c0_i32, %c0_i32_0 : i32, i32, i32
  }
  func.func @transform_1(%arg0: i32) -> (i32, i32, i32) {
    %c0_i32 = arith.constant 0 : i32
    %c0_i32_0 = arith.constant 0 : i32
    %c0_i32_1 = arith.constant 0 : i32
    return %arg0, %c0_i32, %c0_i32_0 : i32, i32, i32
  }
  func.func @transform_2(%arg0: i32) -> (i32, i32, i32) {
    %c0_i32 = arith.constant 0 : i32
    %c0_i32_0 = arith.constant 0 : i32
    %c0_i32_1 = arith.constant 0 : i32
    return %arg0, %c0_i32, %c0_i32_0 : i32, i32, i32
  }
  func.func @transform_3(%arg0: i32) -> (i32, i32, i32) {
    %c0_i32 = arith.constant 0 : i32
    %c0_i32_0 = arith.constant 0 : i32
    %c0_i32_1 = arith.constant 0 : i32
    return %arg0, %c0_i32, %c0_i32_0 : i32, i32, i32
  }
}

module attributes {stable_mosaic.version = 11 : i64} {
  func.func @_hsa_attn_kernel(%arg0: i32, %arg1: memref<1x4x256xf32, #tpu.memory_space<vmem>>, %arg2: memref<1x64x4xf32, #tpu.memory_space<vmem>>, %arg3: memref<1x32x64xf32, #tpu.memory_space<vmem>>, %arg4: memref<1x32x256xf32, #tpu.memory_space<vmem>>) attributes {dimension_semantics = [#tpu.dimension_semantics<parallel>], iteration_bounds = array<i64: 2>, scalar_prefetch = 0 : i64, scratch_operands = 0 : i64, tpu.core_type = #tpu.core_type<tc>, window_params = [{transform_indices = @transform_0, window_bounds = array<i64: 1, 4, 256>}, {transform_indices = @transform_1, window_bounds = array<i64: 1, 64, 4>}, {transform_indices = @transform_2, window_bounds = array<i64: 1, 32, 64>}, {transform_indices = @transform_3, window_bounds = array<i64: 1, 32, 256>}]} {
    %c0 = arith.constant 0 : index
    %c0_0 = arith.constant 0 : index
    %c0_1 = arith.constant 0 : index
    %0 = vector.load %arg1[%c0, %c0_0, %c0_1] : memref<1x4x256xf32, #tpu.memory_space<vmem>>, vector<1x4x256xf32>
    %1 = vector.shape_cast %0 : vector<1x4x256xf32> to vector<4x256xf32>
    %c0_2 = arith.constant 0 : index
    %c0_3 = arith.constant 0 : index
    %c0_4 = arith.constant 0 : index
    %2 = vector.load %arg2[%c0_2, %c0_3, %c0_4] : memref<1x64x4xf32, #tpu.memory_space<vmem>>, vector<1x64x4xf32>
    %3 = vector.shape_cast %2 : vector<1x64x4xf32> to vector<64x4xf32>
    %c0_5 = arith.constant 0 : index
    %c0_6 = arith.constant 0 : index
    %c0_7 = arith.constant 0 : index
    %4 = vector.load %arg3[%c0_5, %c0_6, %c0_7] : memref<1x32x64xf32, #tpu.memory_space<vmem>>, vector<1x32x64xf32>
    %5 = vector.shape_cast %4 : vector<1x32x64xf32> to vector<32x64xf32>
    %cst = arith.constant dense<0.000000e+00> : vector<64x256xf32>
    %6 = tpu.matmul %3, %1, %cst {dimension_numbers = #tpu.dot_dimension_numbers<[1], [0], [0], [1], [0, 0, 1, 1], [], []>} : vector<64x4xf32>, vector<4x256xf32>, vector<64x256xf32> -> vector<64x256xf32>
    %cst_8 = arith.constant dense<0xFF800000> : vector<64xf32>
    %7 = vector.multi_reduction <maximumf>, %6, %cst_8 [1] : vector<64x256xf32> to vector<64xf32>
    %8 = vector.shape_cast %7 : vector<64xf32> to vector<64x1xf32>
    %9 = vector.broadcast %8 : vector<64x1xf32> to vector<64x256xf32>
    %10 = arith.subf %6, %9 : vector<64x256xf32>
    %11 = math.exp %10 : vector<64x256xf32>
    %cst_9 = arith.constant dense<0.000000e+00> : vector<64xf32>
    %12 = vector.multi_reduction <add>, %11, %cst_9 [1] : vector<64x256xf32> to vector<64xf32>
    %13 = vector.shape_cast %12 : vector<64xf32> to vector<64x1xf32>
    %14 = vector.broadcast %13 : vector<64x1xf32> to vector<64x256xf32>
    %15 = arith.divf %11, %14 : vector<64x256xf32>
    %cst_10 = arith.constant dense<0.000000e+00> : vector<32x256xf32>
    %16 = tpu.matmul %5, %15, %cst_10 {dimension_numbers = #tpu.dot_dimension_numbers<[1], [0], [0], [1], [0, 0, 1, 1], [], []>} : vector<32x64xf32>, vector<64x256xf32>, vector<32x256xf32> -> vector<32x256xf32>
    %c0_11 = arith.constant 0 : index
    %c0_12 = arith.constant 0 : index
    %c0_13 = arith.constant 0 : index
    %17 = vector.load %arg4[%c0_11, %c0_12, %c0_13] : memref<1x32x256xf32, #tpu.memory_space<vmem>>, vector<1x32x256xf32>
    %18 = vector.shape_cast %17 : vector<1x32x256xf32> to vector<32x256xf32>
    %19 = vector.shape_cast %16 : vector<32x256xf32> to vector<1x32x256xf32>
    tpu.vector_store %arg4[%c0_11, %c0_12, %c0_13], %19 {strides = array<i32>} : memref<1x32x256xf32, #tpu.memory_space<vmem>>, vector<1x32x256xf32>,
    return
  }
  func.func @transform_0(%arg0: i32) -> (i32, i32, i32) {
    %c0_i32 = arith.constant 0 : i32
    %c0_i32_0 = arith.constant 0 : i32
    %c0_i32_1 = arith.constant 0 : i32
    return %arg0, %c0_i32, %c0_i32_0 : i32, i32, i32
  }
  func.func @transform_1(%arg0: i32) -> (i32, i32, i32) {
    %c0_i32 = arith.constant 0 : i32
    %c0_i32_0 = arith.constant 0 : i32
    %c0_i32_1 = arith.constant 0 : i32
    return %arg0, %c0_i32, %c0_i32_0 : i32, i32, i32
  }
  func.func @transform_2(%arg0: i32) -> (i32, i32, i32) {
    %c0_i32 = arith.constant 0 : i32
    %c0_i32_0 = arith.constant 0 : i32
    %c0_i32_1 = arith.constant 0 : i32
    return %arg0, %c0_i32, %c0_i32_0 : i32, i32, i32
  }
  func.func @transform_3(%arg0: i32) -> (i32, i32, i32) {
    %c0_i32 = arith.constant 0 : i32
    %c0_i32_0 = arith.constant 0 : i32
    %c0_i32_1 = arith.constant 0 : i32
    return %arg0, %c0_i32, %c0_i32_0 : i32, i32, i32
  }
}

module attributes {stable_mosaic.version = 11 : i64} {
  func.func @_hsa_attn_kernel(%arg0: i32, %arg1: memref<1x4x256xf32, #tpu.memory_space<vmem>>, %arg2: memref<1x4x4xf32, #tpu.memory_space<vmem>>, %arg3: memref<1x32x4xf32, #tpu.memory_space<vmem>>, %arg4: memref<1x32x256xf32, #tpu.memory_space<vmem>>) attributes {dimension_semantics = [#tpu.dimension_semantics<parallel>], iteration_bounds = array<i64: 2>, scalar_prefetch = 0 : i64, scratch_operands = 0 : i64, tpu.core_type = #tpu.core_type<tc>, window_params = [{transform_indices = @transform_0, window_bounds = array<i64: 1, 4, 256>}, {transform_indices = @transform_1, window_bounds = array<i64: 1, 4, 4>}, {transform_indices = @transform_2, window_bounds = array<i64: 1, 32, 4>}, {transform_indices = @transform_3, window_bounds = array<i64: 1, 32, 256>}]} {
    %c0 = arith.constant 0 : index
    %c0_0 = arith.constant 0 : index
    %c0_1 = arith.constant 0 : index
    %0 = vector.load %arg1[%c0, %c0_0, %c0_1] : memref<1x4x256xf32, #tpu.memory_space<vmem>>, vector<1x4x256xf32>
    %1 = vector.shape_cast %0 : vector<1x4x256xf32> to vector<4x256xf32>
    %c0_2 = arith.constant 0 : index
    %c0_3 = arith.constant 0 : index
    %c0_4 = arith.constant 0 : index
    %2 = vector.load %arg2[%c0_2, %c0_3, %c0_4] : memref<1x4x4xf32, #tpu.memory_space<vmem>>, vector<1x4x4xf32>
    %3 = vector.shape_cast %2 : vector<1x4x4xf32> to vector<4x4xf32>
    %c0_5 = arith.constant 0 : index
    %c0_6 = arith.constant 0 : index
    %c0_7 = arith.constant 0 : index
    %4 = vector.load %arg3[%c0_5, %c0_6, %c0_7] : memref<1x32x4xf32, #tpu.memory_space<vmem>>, vector<1x32x4xf32>
    %5 = vector.shape_cast %4 : vector<1x32x4xf32> to vector<32x4xf32>
    %cst = arith.constant dense<0.000000e+00> : vector<4x256xf32>
    %6 = tpu.matmul %3, %1, %cst {dimension_numbers = #tpu.dot_dimension_numbers<[1], [0], [0], [1], [0, 0, 1, 1], [], []>} : vector<4x4xf32>, vector<4x256xf32>, vector<4x256xf32> -> vector<4x256xf32>
    %cst_8 = arith.constant dense<0xFF800000> : vector<4xf32>
    %7 = vector.multi_reduction <maximumf>, %6, %cst_8 [1] : vector<4x256xf32> to vector<4xf32>
    %8 = vector.shape_cast %7 : vector<4xf32> to vector<4x1xf32>
    %9 = vector.broadcast %8 : vector<4x1xf32> to vector<4x256xf32>
    %10 = arith.subf %6, %9 : vector<4x256xf32>
    %11 = math.exp %10 : vector<4x256xf32>
    %cst_9 = arith.constant dense<0.000000e+00> : vector<4xf32>
    %12 = vector.multi_reduction <add>, %11, %cst_9 [1] : vector<4x256xf32> to vector<4xf32>
    %13 = vector.shape_cast %12 : vector<4xf32> to vector<4x1xf32>
    %14 = vector.broadcast %13 : vector<4x1xf32> to vector<4x256xf32>
    %15 = arith.divf %11, %14 : vector<4x256xf32>
    %cst_10 = arith.constant dense<0.000000e+00> : vector<32x256xf32>
    %16 = tpu.matmul %5, %15, %cst_10 {dimension_numbers = #tpu.dot_dimension_numbers<[1], [0], [0], [1], [0, 0, 1, 1], [], []>} : vector<32x4xf32>, vector<4x256xf32>, vector<32x256xf32> -> vector<32x256xf32>
    %c0_11 = arith.constant 0 : index
    %c0_12 = arith.constant 0 : index
    %c0_13 = arith.constant 0 : index
    %17 = vector.load %arg4[%c0_11, %c0_12, %c0_13] : memref<1x32x256xf32, #tpu.memory_space<vmem>>, vector<1x32x256xf32>
    %18 = vector.shape_cast %17 : vector<1x32x256xf32> to vector<32x256xf32>
    %19 = vector.shape_cast %16 : vector<32x256xf32> to vector<1x32x256xf32>
    tpu.vector_store %arg4[%c0_11, %c0_12, %c0_13], %19 {strides = array<i32>} : memref<1x32x256xf32, #tpu.memory_space<vmem>>, vector<1x32x256xf32>,
    return
  }
  func.func @transform_0(%arg0: i32) -> (i32, i32, i32) {
    %c0_i32 = arith.constant 0 : i32
    %c0_i32_0 = arith.constant 0 : i32
    %c0_i32_1 = arith.constant 0 : i32
    return %arg0, %c0_i32, %c0_i32_0 : i32, i32, i32
  }
  func.func @transform_1(%arg0: i32) -> (i32, i32, i32) {
    %c0_i32 = arith.constant 0 : i32
    %c0_i32_0 = arith.constant 0 : i32
    %c0_i32_1 = arith.constant 0 : i32
    return %arg0, %c0_i32, %c0_i32_0 : i32, i32, i32
  }
  func.func @transform_2(%arg0: i32) -> (i32, i32, i32) {
    %c0_i32 = arith.constant 0 : i32
    %c0_i32_0 = arith.constant 0 : i32
    %c0_i32_1 = arith.constant 0 : i32
    return %arg0, %c0_i32, %c0_i32_0 : i32, i32, i32
  }
  func.func @transform_3(%arg0: i32) -> (i32, i32, i32) {
    %c0_i32 = arith.constant 0 : i32
    %c0_i32_0 = arith.constant 0 : i32
    %c0_i32_1 = arith.constant 0 : i32
    return %arg0, %c0_i32, %c0_i32_0 : i32, i32, i32
  }
}

module attributes {stable_mosaic.version = 11 : i64} {
  func.func @_hsa_attn_kernel(%arg0: i32, %arg1: memref<1x4x256xf32, #tpu.memory_space<vmem>>, %arg2: memref<1x16x4xf32, #tpu.memory_space<vmem>>, %arg3: memref<1x32x16xf32, #tpu.memory_space<vmem>>, %arg4: memref<1x32x256xf32, #tpu.memory_space<vmem>>) attributes {dimension_semantics = [#tpu.dimension_semantics<parallel>], iteration_bounds = array<i64: 2>, scalar_prefetch = 0 : i64, scratch_operands = 0 : i64, tpu.core_type = #tpu.core_type<tc>, window_params = [{transform_indices = @transform_0, window_bounds = array<i64: 1, 4, 256>}, {transform_indices = @transform_1, window_bounds = array<i64: 1, 16, 4>}, {transform_indices = @transform_2, window_bounds = array<i64: 1, 32, 16>}, {transform_indices = @transform_3, window_bounds = array<i64: 1, 32, 256>}]} {
    %c0 = arith.constant 0 : index
    %c0_0 = arith.constant 0 : index
    %c0_1 = arith.constant 0 : index
    %0 = vector.load %arg1[%c0, %c0_0, %c0_1] : memref<1x4x256xf32, #tpu.memory_space<vmem>>, vector<1x4x256xf32>
    %1 = vector.shape_cast %0 : vector<1x4x256xf32> to vector<4x256xf32>
    %c0_2 = arith.constant 0 : index
    %c0_3 = arith.constant 0 : index
    %c0_4 = arith.constant 0 : index
    %2 = vector.load %arg2[%c0_2, %c0_3, %c0_4] : memref<1x16x4xf32, #tpu.memory_space<vmem>>, vector<1x16x4xf32>
    %3 = vector.shape_cast %2 : vector<1x16x4xf32> to vector<16x4xf32>
    %c0_5 = arith.constant 0 : index
    %c0_6 = arith.constant 0 : index
    %c0_7 = arith.constant 0 : index
    %4 = vector.load %arg3[%c0_5, %c0_6, %c0_7] : memref<1x32x16xf32, #tpu.memory_space<vmem>>, vector<1x32x16xf32>
    %5 = vector.shape_cast %4 : vector<1x32x16xf32> to vector<32x16xf32>
    %cst = arith.constant dense<0.000000e+00> : vector<16x256xf32>
    %6 = tpu.matmul %3, %1, %cst {dimension_numbers = #tpu.dot_dimension_numbers<[1], [0], [0], [1], [0, 0, 1, 1], [], []>} : vector<16x4xf32>, vector<4x256xf32>, vector<16x256xf32> -> vector<16x256xf32>
    %cst_8 = arith.constant dense<0xFF800000> : vector<16xf32>
    %7 = vector.multi_reduction <maximumf>, %6, %cst_8 [1] : vector<16x256xf32> to vector<16xf32>
    %8 = vector.shape_cast %7 : vector<16xf32> to vector<16x1xf32>
    %9 = vector.broadcast %8 : vector<16x1xf32> to vector<16x256xf32>
    %10 = arith.subf %6, %9 : vector<16x256xf32>
    %11 = math.exp %10 : vector<16x256xf32>
    %cst_9 = arith.constant dense<0.000000e+00> : vector<16xf32>
    %12 = vector.multi_reduction <add>, %11, %cst_9 [1] : vector<16x256xf32> to vector<16xf32>
    %13 = vector.shape_cast %12 : vector<16xf32> to vector<16x1xf32>
    %14 = vector.broadcast %13 : vector<16x1xf32> to vector<16x256xf32>
    %15 = arith.divf %11, %14 : vector<16x256xf32>
    %cst_10 = arith.constant dense<0.000000e+00> : vector<32x256xf32>
    %16 = tpu.matmul %5, %15, %cst_10 {dimension_numbers = #tpu.dot_dimension_numbers<[1], [0], [0], [1], [0, 0, 1, 1], [], []>} : vector<32x16xf32>, vector<16x256xf32>, vector<32x256xf32> -> vector<32x256xf32>
    %c0_11 = arith.constant 0 : index
    %c0_12 = arith.constant 0 : index
    %c0_13 = arith.constant 0 : index
    %17 = vector.load %arg4[%c0_11, %c0_12, %c0_13] : memref<1x32x256xf32, #tpu.memory_space<vmem>>, vector<1x32x256xf32>
    %18 = vector.shape_cast %17 : vector<1x32x256xf32> to vector<32x256xf32>
    %19 = vector.shape_cast %16 : vector<32x256xf32> to vector<1x32x256xf32>
    tpu.vector_store %arg4[%c0_11, %c0_12, %c0_13], %19 {strides = array<i32>} : memref<1x32x256xf32, #tpu.memory_space<vmem>>, vector<1x32x256xf32>,
    return
  }
  func.func @transform_0(%arg0: i32) -> (i32, i32, i32) {
    %c0_i32 = arith.constant 0 : i32
    %c0_i32_0 = arith.constant 0 : i32
    %c0_i32_1 = arith.constant 0 : i32
    return %arg0, %c0_i32, %c0_i32_0 : i32, i32, i32
  }
  func.func @transform_1(%arg0: i32) -> (i32, i32, i32) {
    %c0_i32 = arith.constant 0 : i32
    %c0_i32_0 = arith.constant 0 : i32
    %c0_i32_1 = arith.constant 0 : i32
    return %arg0, %c0_i32, %c0_i32_0 : i32, i32, i32
  }
  func.func @transform_2(%arg0: i32) -> (i32, i32, i32) {
    %c0_i32 = arith.constant 0 : i32
    %c0_i32_0 = arith.constant 0 : i32
    %c0_i32_1 = arith.constant 0 : i32
    return %arg0, %c0_i32, %c0_i32_0 : i32, i32, i32
  }
  func.func @transform_3(%arg0: i32) -> (i32, i32, i32) {
    %c0_i32 = arith.constant 0 : i32
    %c0_i32_0 = arith.constant 0 : i32
    %c0_i32_1 = arith.constant 0 : i32
    return %arg0, %c0_i32, %c0_i32_0 : i32, i32, i32
  }
}

</mosaic_0001>

<bundles_post_ra>
// kernel: hsa_forward.5
= control target key start
LH: loop header
LB: loop body
LE: loop exit
PB: predicated region body
PF: predicated region fallthrough
CT: control target
= control target key end

     0   :  { %s758_s12 = smov 0   ;;  %s760_s13 = smov 0   ;;  %s895_s0 = inlined_call_operand.vmem [shape: f32[2,32,1024], index: 0, kind: input, shape index: {}]   ;;  %s896_s1 = inlined_call_operand.vmem [shape: f32[4,40,32], index: 1, kind: input, shape index: {}]   ;;  %s897_s2 = inlined_call_operand.vmem [shape: f32[4,40,1], index: 2, kind: input, shape index: {}]   ;;  %s898_s3 = inlined_call_operand.vmem [shape: f32[2,40,1024], index: 3, kind: output, shape index: {}]  }
   0x1   :  { %s762_s14 = smov 0   ;;  %s764_s15 = smov 0  }
   0x2   :  { %s766_s16 = smov 0   ;;  %s768_s17 = smov 0  }
   0x3   :  { %s770_s18 = smov 0  }
   0x4 LB: > { %s28_s19 = sadd.s32 1, %s726_s16  ;;  %s32_s20 = sadd.s32 1, %s730_s17  ;;  %s734_s18 = sphi %s770_s18, %s13_s18   ;;  %s730_s17 = sphi %s768_s17, %s905_s17   ;;  %s726_s16 = sphi %s766_s16, %s904_s16   ;;  %s722_s15 = sphi %s764_s15, %s903_s15   ;;  %s718_s14 = sphi %s762_s14, %s902_s14   ;;  %s714_s13 = sphi %s760_s13, %s901_s13   ;;  %s710_s12 = sphi %s758_s12, %s900_s12  }
   0x5   : > { %p30_p0 = scmp.ge.s32.totalorder %s28_s19, 2  ;;  %s588_s21 = sadd.s32 4294967295, %s734_s18  }
   0x6   : > { %p50_p1 = scmp.ne.s32.totalorder %s714_s13, %s710_s12  ;;  %p51_p2 = scmp.eq.s32.totalorder %s734_s18, 0 }
   0x7   : > { %s907_s19 = smov (%p30_p0, %s28_s19), 0  ;;  %s909_s20 = smov (!%p30_p0, %s32_s20), %s730_s17 }
   0x8   : > { %p34_p3 = scmp.ge.s32.totalorder %s909_s20, 4  ;;  %p136_p4 = scmp.eq.s32.totalorder %s588_s21, 7 }
   0x9   : > { %s38_s22 = ssub.s32 %s726_s16, %s907_s19  ;;  %p52_p5 = por %p51_p2, %p50_p1 }
   0xa   : > { %s911_s20 = smov (%p34_p3, %s909_s20), 0  ;;  %p806_p6 = por %p136_p4, %p50_p1 }
   0xb   : > { %s39_s24 = ssub.s32 %s730_s17, %s911_s20  ;;  %s43_s26 = sadd.s32 1, %s714_s13 }
   0xc   : > { %s40_s25 = sor.u32 %s39_s24, %s38_s22  ;;  %p591_p8 = scmp.ge.s32.totalorder %s734_s18, 8 }
   0xd   : > { %p41_p7 = scmp.eq.s32.totalorder %s40_s25, 0 }
   0xe   : > { %158 = sbr.rel (%p591_p8) target bundleno = 30 (0x1e), region = 16 }
   0xf   : > { %s814_s27 = scalar_select %p41_p7, %s714_s13, %s43_s26  }
  0x13   : > { %161 = sbr.rel (!%p52_p5) target bundleno = 30 (0x1e), region = 20  ;;  %s163_s28 = sand.u32 (%p52_p5), 1, %s714_s13  }
  0x14   : > { %s593_s29 = sshll.u32 (%p52_p5), %s730_s17, 1  ;;  %s592_s30 = sshll.u32 (%p52_p5), %s163_s28, 6 }
  0x15   : > { %s594_s4 = sshll.u32 (%p52_p5), %s726_s16, 5  ;;  %s165_s10 = scalar_lea.vmem (%p52_p5), [#allocation2], %s592_s30 }
  0x16   : > { %s169_s5 = sadd.s32 (%p52_p5), %s594_s4, %s593_s29 }
  0x17   : > { %s595_s6 = sshll.u32 (%p52_p5), %s169_s5, 3 }
  0x18   : > { %s171_s9 = scalar_lea.vmem %s895_s0, %s595_s6 }
  0x19   : > { %v184_v0 = vld [vmem:[%s171_s9] sm:$0xff]  ;;  %v186_v1 = vld [vmem:[%s171_s9 + $0x8] sm:$0xff] }
  0x1a   : > { %v188_v2 = vld [vmem:[%s171_s9 + $0x40] sm:$0xff]  ;;  %185 = vst [vmem:[%s165_s10] sm:$0xff] %v184_v0  ;;  %187 = vst [vmem:[%s165_s10 + $0x8] sm:$0xff] %v186_v1  ;;  %v190_v3 = vld [vmem:[%s171_s9 + $0x48] sm:$0xff] }
  0x1b   : > { %189 = vst [vmem:[%s165_s10 + $0x10] sm:$0xff] %v188_v2  ;;  %v192_v4 = vld [vmem:[%s171_s9 + $0x80] sm:$0xff]  ;;  %v194_v5 = vld [vmem:[%s171_s9 + $0x88] sm:$0xff]  ;;  %191 = vst [vmem:[%s165_s10 + $0x18] sm:$0xff] %v190_v3 }
  0x1c   : > { %193 = vst [vmem:[%s165_s10 + $0x20] sm:$0xff] %v192_v4  ;;  %195 = vst [vmem:[%s165_s10 + $0x28] sm:$0xff] %v194_v5  ;;  %v196_v6 = vld [vmem:[%s171_s9 + $0xc0] sm:$0xff]  ;;  %v198_v7 = vld [vmem:[%s171_s9 + $0xc8] sm:$0xff] }
  0x1d   : > { %197 = vst [vmem:[%s165_s10 + $0x30] sm:$0xff] %v196_v6  ;;  %199 = vst [vmem:[%s165_s10 + $0x38] sm:$0xff] %v198_v7 }
  0x1e PF: > { %p596_p9 = scmp.ge.s32.totalorder %s734_s18, 1  ;;  %p220_p10 = scmp.lt.s32.totalorder %s734_s18, 9 }
  0x20   : > { %p221_p11 = pnand %p596_p9, %p220_p10 }
  0x21   : > { %s227_s11 = sand.u32 (!%p221_p11), 1, %s710_s12   ;;  %p261_p12 = scmp.lt.s32.totalorder (!%p221_p11), %s722_s15, 3 }
  0x22   : > { %224 = sbr.rel (%p221_p11) target bundleno = 264 (0x108), region = 51  ;;  %s597_s21 = sshll.u32 (!%p221_p11), %s227_s11, 6 }
  0x23   : > { %s229_s22 = scalar_lea.vmem (!%p221_p11), [#allocation2], %s597_s21  ;;  %s617_s6 = smul.u32 (!%p221_p11), 80, %s227_s11 }
  0x25   : > { %s845_s7 = scalar_lea.vmem (!%p221_p11), [#allocation3], %s617_s6 }
  0x27   : > { %v736_v8 = vmov 0.0   ;;  %v737_v9 = vmov 0   ;;  %v285_v10 = vld [vmem:[%s229_s22 + $0x38] sm:$0xff]  ;;  %v284_v11 = vld [vmem:[%s229_s22 + $0x30] sm:$0xff]  ;;  %v283_v12 = vld [vmem:[%s229_s22 + $0x28] sm:$0xff]  ;;  %s262_s24 = scalar_select %p261_p12, %s722_s15, 3 }
  0x28   : > { %396 = vmatprep.mubr.f32.mxu0 %v736_v8  ;;  %414 = vmatprep.mubr.f32.mxu1 %v736_v8  ;;  %v282_v13 = vld [vmem:[%s229_s22 + $0x20] sm:$0xff]  ;;  %v281_v14 = vld [vmem:[%s229_s22 + $0x18] sm:$0xff]  ;;  %v280_v15 = vld [vmem:[%s229_s22 + $0x10] sm:$0xff]  ;;  %vm316_vm0 = vcmask 261120   ;;  %s605_s12 = sshll.u32 (%p806_p6), %s722_s15, 1  ;;  %s619_s8 = smul.u32 (%p806_p6), 40, %s718_s14 }
  0x29   : > { %678 = vset.pattern.permute.xlu0 %v737_v9  ;;  %679 = vset.pattern.permute.xlu1 %v737_v9  ;;  %s618_s25 = smul.u32 40, %s262_s24  ;;  %v279_v16 = vld [vmem:[%s229_s22 + $0x8] sm:$0xff]  ;;  %v278_v17 = vld [vmem:[%s229_s22] sm:$0xff] }
  0x2a   : > { %356 = vmatprep.subr.mxu0 %v285_v10  ;;  %609 = vmatprep.subr.mxu1 %v285_v10  ;;  %s447_s23 = sadd.s32 (%p806_p6), %s619_s8, %s605_s12 }
  0x2b   : > { %357 = vmatpush1.msra.mxu0 %v284_v11  ;;  %613 = vmatpush1.msra.mxu1 %v284_v11  ;;  %s265_s29 = scalar_lea.vmem %s896_s1, %s618_s25  ;;  %s270_s5 = scalar_lea.vmem %s897_s2, %s618_s25 }
  0x2c   : > { %358 = vmatprep.subr.mxu0 %v283_v12  ;;  %610 = vmatprep.subr.mxu1 %v283_v12  ;;  %v273_v18 = vld [vmem:[%s265_s29] sm:$0xff]  ;;  %v276_v19 = vld [vmem:[%s265_s29 + $0x18] sm:$0xff]  ;;  %v288_v21 = vld [vmem:[%s270_s5 + $0x10] sm:$0xff]  ;;  %s606_s9 = sshll.u32 (%p806_p6), %s447_s23, 3 }
  0x2d   : > { %359 = vmatpush1.msra.mxu0 %v282_v13  ;;  %614 = vmatpush1.msra.mxu1 %v282_v13  ;;  %v286_v20 = vld [vmem:[%s270_s5] sm:$0xff]  ;;  %v274_v22 = vld [vmem:[%s265_s29 + $0x8] sm:$0xff]  ;;  %v289_v25 = vld [vmem:[%s270_s5 + $0x18] sm:$0xff]  ;;  %s449_s21 = scalar_lea.vmem (%p806_p6), %s898_s3, %s606_s9 }
  0x2e   : > { %360 = vmatprep.subr.mxu0 %v281_v14  ;;  %611 = vmatprep.subr.mxu1 %v281_v14  ;;  %v277_v23 = vld [vmem:[%s265_s29 + $0x20] sm:$0xff]  ;;  %v287_v24 = vld [vmem:[%s270_s5 + $0x8] sm:$0xff]  ;;  %v275_v26 = vld [vmem:[%s265_s29 + $0x10] sm:$0xff] }
  0x2f   : > { %361 = vmatpush1.msra.mxu0 %v280_v15  ;;  %615 = vmatpush1.msra.mxu1 %v280_v15  ;;  %v290_v27 = vld [vmem:[%s270_s5 + $0x20] sm:$0xff] }
  0x30   : > { %362 = vmatprep.subr.mxu0 %v279_v16  ;;  %612 = vmatprep.subr.mxu1 %v279_v16 }
  0x31   : > { %363 = vmatpush1.msra.mxu0 %v278_v17  ;;  %616 = vmatpush1.msra.mxu1 %v278_v17 }
  0x32   : > { %600 = vmatmul.mubr.msk.f32.vlgmr.msra.gmra.mxu0 %vm316_vm0, %v273_v18  ;;  %603 = vmatmul.mubr.msk.f32.vlgmr.msra.gmra.mxu1 %vm316_vm0, %v276_v19 }
  0x33   : > { %402 = vmatprep.mubr.f32.mxu0 %v736_v8  ;;  %420 = vmatprep.mubr.f32.mxu1 %v736_v8 }
  0x34   : > { %293 = vperm.xlu0 %678, %v286_v20   ;;  %303 = vperm.xlu1 %679, %v288_v21  }
  0x36   : > { %601 = vmatmul.mubr.msk.f32.gmra.mxu0 %vm316_vm0, %v274_v22  ;;  %604 = vmatmul.mubr.msk.f32.gmra.mxu1 %vm316_vm0, %v277_v23 }
  0x37   : > { %408 = vmatprep.mubr.f32.mxu0 %v736_v8 }
  0x38   : > { %298 = vperm.xlu0 %678, %v287_v24   ;;  %308 = vperm.xlu1 %679, %v289_v25  }
  0x3a   : > { %602 = vmatmul.mubr.msk.f32.gmra.mxu0 %vm316_vm0, %v275_v26 }
  0x3c   : > { %313 = vperm.xlu0 %678, %v290_v27  }
  0xaf   : > { %v294_v28 = vpop.permute.xlu0 %293  ;;  %v304_v29 = vpop.permute.xlu1 %303 }
  0xb3   : > { %v299_v30 = vpop.permute.xlu0 %298  ;;  %v309_v31 = vpop.permute.xlu1 %308 }
  0xb7   : > { %v314_v38 = vpop.permute.xlu0 %313 }
  0xf2   : > { %v398_v32 = vpop.f32.mrf.mxu0  ;;  %v416_v33 = vpop.f32.mrf.mxu1 }
  0xf3   : > { %v399_v34 = vadd.f32 %v398_v32, %v294_v28  ;;  %v417_v35 = vadd.f32 %v416_v33, %v309_v31 }
  0xf4   : > { %v400_v36 = vpop.f32.mrf.mxu0  ;;  %v418_v37 = vpop.f32.mrf.mxu1 }
  0xf5   : > { %427 = vst [vmem:[%s845_s7] sm:$0xff] %v399_v34  ;;  %v401_v39 = vadd.f32 %v400_v36, %v294_v28  ;;  %v419_v40 = vadd.f32 %v418_v37, %v309_v31  ;;  %433 = vst [vmem:[%s845_s7 + $0x30] sm:$0xff] %v417_v35 }
  0xf6   : > { %v404_v41 = vpop.f32.mrf.mxu0  ;;  %v422_v42 = vpop.f32.mrf.mxu1 }
  0xf7   : > { %428 = vst [vmem:[%s845_s7 + $0x8] sm:$0xff] %v401_v39  ;;  %434 = vst [vmem:[%s845_s7 + $0x38] sm:$0xff] %v419_v40  ;;  %v405_v43 = vadd.f32 %v404_v41, %v299_v30  ;;  %v423_v44 = vadd.f32 %v422_v42, %v314_v38 }
  0xf8   : > { %v406_v45 = vpop.f32.mrf.mxu0  ;;  %v424_v46 = vpop.f32.mrf.mxu1 }
  0xf9   : > { %429 = vst [vmem:[%s845_s7 + $0x10] sm:$0xff] %v405_v43  ;;  %435 = vst [vmem:[%s845_s7 + $0x40] sm:$0xff] %v423_v44  ;;  %v407_v47 = vadd.f32 %v406_v45, %v299_v30  ;;  %v425_v48 = vadd.f32 %v424_v46, %v314_v38 }
  0xfa   : > { %v410_v49 = vpop.f32.mrf.mxu0 }
  0xfb   : > { %430 = vst [vmem:[%s845_s7 + $0x18] sm:$0xff] %v407_v47  ;;  %436 = vst [vmem:[%s845_s7 + $0x48] sm:$0xff] %v425_v48  ;;  %v411_v50 = vadd.f32 %v410_v49, %v304_v29  ;;  %443 = sbr.rel (!%p806_p6) target bundleno = 264 (0x108), region = 59 }
  0xfc   : > { %v412_v51 = vpop.f32.mrf.mxu0  ;;  %v462_v53 = vld [vmem:[%s845_s7] sm:$0xff] (%p806_p6)  ;;  %v474_v59 = vld [vmem:[%s845_s7 + $0x30] sm:$0xff] (%p806_p6) }
  0xfd   : > { %431 = vst [vmem:[%s845_s7 + $0x20] sm:$0xff] %v411_v50  ;;  %v413_v52 = vadd.f32 %v412_v51, %v304_v29  ;;  %463 = vst [vmem:[%s449_s21] sm:$0xff] (%p806_p6), %v462_v53 }
  0xfe   : > { %v464_v54 = vld [vmem:[%s845_s7 + $0x8] sm:$0xff] (%p806_p6)  ;;  %v476_v60 = vld [vmem:[%s845_s7 + $0x38] sm:$0xff] (%p806_p6)  ;;  %475 = vst [vmem:[%s449_s21 + $0xc0] sm:$0xff] (%p806_p6), %v474_v59 }
  0xff   : > { %432 = vst [vmem:[%s845_s7 + $0x28] sm:$0xff] %v413_v52  ;;  %465 = vst [vmem:[%s449_s21 + $0x8] sm:$0xff] (%p806_p6), %v464_v54 }
 0x100   : > { %v466_v55 = vld [vmem:[%s845_s7 + $0x10] sm:$0xff]  ;;  %v478_v61 = vld [vmem:[%s845_s7 + $0x40] sm:$0xff]  ;;  %477 = vst [vmem:[%s449_s21 + $0xc8] sm:$0xff] %v476_v60 }
 0x101   : > { %467 = vst [vmem:[%s449_s21 + $0x40] sm:$0xff] %v466_v55  ;;  %479 = vst [vmem:[%s449_s21 + $0x100] sm:$0xff] %v478_v61 }
 0x102   : > { %v468_v56 = vld [vmem:[%s845_s7 + $0x18] sm:$0xff]  ;;  %v480_v62 = vld [vmem:[%s845_s7 + $0x48] sm:$0xff] }
 0x103   : > { %469 = vst [vmem:[%s449_s21 + $0x48] sm:$0xff] %v468_v56  ;;  %481 = vst [vmem:[%s449_s21 + $0x108] sm:$0xff] %v480_v62 }
 0x104   : > { %v470_v57 = vld [vmem:[%s845_s7 + $0x20] sm:$0xff] }
 0x105   : > { %471 = vst [vmem:[%s449_s21 + $0x80] sm:$0xff] %v470_v57 }
 0x106   : > { %v472_v58 = vld [vmem:[%s845_s7 + $0x28] sm:$0xff] }
 0x107   : > { %473 = vst [vmem:[%s449_s21 + $0x88] sm:$0xff] %v472_v58 }
 0x108 PF: > { %s13_s18 = sadd.s32 1, %s734_s18   ;;  %s900_s12 = smov %s714_s13 }
 0x109   : > { %p10_p13 = scmp.ge.s32.totalorder %s13_s18, 10   ;;  %s901_s13 = smov %s814_s27 }
 0x10a   : > { %s902_s14 = smov %s726_s16  ;;  %s903_s15 = smov %s730_s17 }
 0x10b   : > { %s904_s16 = smov %s907_s19  ;;  %s905_s17 = smov %s911_s20 }
 0x10c   :  { %12 = sbr.rel (!%p10_p13) target bundleno = 4 (0x4), region = 119 }

// kernel: hsa_forward.9
= control target key start
LH: loop header
LB: loop body
LE: loop exit
PB: predicated region body
PF: predicated region fallthrough
CT: control target
= control target key end

     0   :  { %s577_s12 = smov 0   ;;  %s614_s0 = inlined_call_operand.vmem [shape: f32[2,4,256], index: 0, kind: input, shape index: {}]   ;;  %s615_s1 = inlined_call_operand.vmem [shape: f32[2,1,4], index: 1, kind: input, shape index: {}]   ;;  %s616_s2 = inlined_call_operand.vmem [shape: f32[2,32,1], index: 2, kind: input, shape index: {}]   ;;  %s617_s3 = inlined_call_operand.vmem [shape: f32[2,32,256], index: 3, kind: output, shape index: {}]  }
   0x1 LB: > { %s505_s13 = sadd.s32 4294967295, %s554_s12   ;;  %p509_p0 = scmp.ge.s32.totalorder %s554_s12, 1  ;;  %s554_s12 = sphi %s577_s12, %s13_s12  }
   0x2   : > { %p155_p1 = scmp.lt.s32.totalorder %s554_s12, 3 }
   0x4   : > { %p156_p2 = pnand %p509_p0, %p155_p1 }
   0x5   : > { %p187_p3 = scmp.lt.s32.totalorder (!%p156_p2), %s505_s13, 1 }
   0x6   : > { %159 = sbr.rel (%p156_p2) target bundleno = 737 (0x2e1), region = 32 }
   0xb   : > { %v556_v0 = vmov 0.0   ;;  %s619_s13 = smov (!%p187_p3, %s505_s13), 1  ;;  %vm217_vm0 = vcmask 1043456   ;;  %vm213_vm1 = vcmask 31744   ;;  %vm293_vm2 = vcmask 1040384  }
   0xc   : > { %286 = vmatprep.mubr.f32.mxu0 %v556_v0  ;;  %402 = vmatprep.mubr.f32.mxu1 %v556_v0  ;;  %s527_s14 = sshll.u32 %s619_s13, 3  ;;  %s194_s20 = scalar_lea.vmem %s615_s1, %s619_s13  ;;  %vm313_vm3 = vcmask 7168  }
   0xd   : > { %s191_s17 = scalar_lea.vmem %s614_s0, %s527_s14  ;;  %v206_v3 = vld [vmem:[%s194_s20] sm:$0x1]  ;;  %s528_s21 = sshll.u32 %s619_s13, 5 }
   0xe   : > { %v205_v1 = vld [vmem:[%s191_s17] sm:$0xff]  ;;  %s199_s24 = scalar_lea.vmem %s616_s2, %s528_s21  ;;  %s529_s25 = sshll.u32 %s619_s13, 6 }
   0xf   : > { %v212_v2 = vcombine.high %v205_v1, %v205_v1  ;;  %v208_v23 = vld [vmem:[%s199_s24 + $0x8] sm:$0xff]  ;;  %v207_v24 = vld [vmem:[%s199_s24] sm:$0xff]  ;;  %v209_v25 = vld [vmem:[%s199_s24 + $0x10] sm:$0xff]  ;;  %s204_s28 = scalar_lea.vmem %s617_s3, %s529_s25 }
  0x10   : > { %v210_v26 = vld [vmem:[%s199_s24 + $0x18] sm:$0xff] }
  0x11   : > { %516 = vmatprep.subr.msk.mxu0 %vm217_vm0, %v212_v2 }
  0x12   : > { %517 = vmatpush1.msk.msra.mxu0 %vm217_vm0, %v205_v1 }
  0x13   : > { %518 = vmatmul.mubr.msk.f32.vlgmr.msra.gmra.mxu0 %vm213_vm1, %v206_v3 }
  0x14   : > { %396 = vmatprep.mubr.f32.mxu0 %v556_v0 }
  0xd3   : > { %v288_v4 = vpop.f32.mrf.mxu0 }
  0xd4   : > { %v294_v6 = vsel %vm293_vm2, %v288_v4, -inf }
  0xd5   : > { %v290_v5 = vpop.f32.mrf.mxu0 }
  0xd6   : > { %v295_v7 = vsel %vm293_vm2, %v290_v5, -inf }
  0xd7   : > { %v296_v8 = vmax.f32 %v294_v6, %v295_v7 }
  0xd9   : > { %297 = vmax.xlane.f32.xlu0 %v296_v8 }
 0x162   : > { %v298_v9 = vpop.xlane.xlu0 %297 }
 0x163   : > { %v299_v10 = vsub.f32 %v288_v4, %v298_v9  ;;  %v300_v11 = vsub.f32 %v290_v5, %v298_v9 }
 0x165   : > { %v301_v12 = vmul.f32 1.442695, %v299_v10  ;;  %v303_v13 = vmul.f32 1.442695, %v300_v11 }
 0x167   : > { %542 = vpow2.f32 %v301_v12 }
 0x168   : > { %544 = vpow2.f32 %v303_v13 }
 0x174   : > { %v543_v14 = vpop.eup %542 }
 0x175   : > { %v545_v15 = vpop.eup %544  ;;  %v305_v16 = vsel %vm293_vm2, %v543_v14, 0.0 }
 0x176   : > { %v306_v17 = vsel %vm293_vm2, %v545_v15, 0.0 }
 0x177   : > { %v307_v18 = vadd.f32 %v306_v17, %v305_v16 }
 0x179   : > { %308 = vadd.xlane.f32.xlu0 %v307_v18 }
 0x202   : > { %v309_v19 = vpop.xlane.xlu0 %308 }
 0x203   : > { %546 = vrcp.f32 %v309_v19 }
 0x210   : > { %v547_v20 = vpop.eup %546 }
 0x211   : > { %v312_v21 = vmul.f32 %v547_v20, %v545_v15  ;;  %v311_v22 = vmul.f32 %v547_v20, %v543_v14 }
 0x213   : > { %519 = vmatprep.subr.msk.mxu0 %vm293_vm2, %v312_v21  ;;  %530 = vmatprep.subr.msk.mxu1 %vm293_vm2, %v312_v21 }
 0x214   : > { %520 = vmatpush1.msk.msra.mxu0 %vm293_vm2, %v311_v22  ;;  %531 = vmatpush1.msk.msra.mxu1 %vm293_vm2, %v311_v22 }
 0x215   : > { %522 = vmatmul.mubr.msk.f32.vlgmr.msra.gmra.mxu1 %vm313_vm3, %v208_v23  ;;  %521 = vmatmul.mubr.msk.f32.vlgmr.msra.gmra.mxu0 %vm313_vm3, %v207_v24 }
 0x216   : > { %408 = vmatprep.mubr.f32.mxu1 %v556_v0 }
 0x219   : > { %523 = vmatmul.mubr.msk.f32.gmra.mxu1 %vm313_vm3, %v209_v25 }
 0x21a   : > { %414 = vmatprep.mubr.f32.mxu1 %v556_v0 }
 0x21d   : > { %524 = vmatmul.mubr.msk.f32.gmra.mxu1 %vm313_vm3, %v210_v26 }
 0x2d5   : > { %v404_v27 = vpop.f32.mrf.mxu1  ;;  %v398_v28 = vpop.f32.mrf.mxu0 }
 0x2d6   : > { %423 = vst [vmem:[%s204_s28 + $0x10] sm:$0xff] %v404_v27  ;;  %421 = vst [vmem:[%s204_s28] sm:$0xff] %v398_v28 }
 0x2d7   : > { %v406_v29 = vpop.f32.mrf.mxu1  ;;  %v400_v30 = vpop.f32.mrf.mxu0 }
 0x2d8   : > { %424 = vst [vmem:[%s204_s28 + $0x18] sm:$0xff] %v406_v29  ;;  %422 = vst [vmem:[%s204_s28 + $0x8] sm:$0xff] %v400_v30 }
 0x2d9   : > { %v410_v31 = vpop.f32.mrf.mxu1 }
 0x2da   : > { %425 = vst [vmem:[%s204_s28 + $0x20] sm:$0xff] %v410_v31 }
 0x2db   : > { %v412_v32 = vpop.f32.mrf.mxu1 }
 0x2dc   : > { %426 = vst [vmem:[%s204_s28 + $0x28] sm:$0xff] %v412_v32 }
 0x2dd   : > { %v416_v33 = vpop.f32.mrf.mxu1 }
 0x2de   : > { %427 = vst [vmem:[%s204_s28 + $0x30] sm:$0xff] %v416_v33 }
 0x2df   : > { %v418_v34 = vpop.f32.mrf.mxu1 }
 0x2e0   : > { %428 = vst [vmem:[%s204_s28 + $0x38] sm:$0xff] %v418_v34 }
 0x2e1 PF: > { %s13_s12 = sadd.s32 1, %s554_s12  }
 0x2e2   : > { %p10_p4 = scmp.ge.s32.totalorder %s13_s12, 4  }
 0x2e4   :  { %12 = sbr.rel (!%p10_p4) target bundleno = 1 (0x1), region = 68 }

// kernel: hsa_forward.6
= control target key start
LH: loop header
LB: loop body
LE: loop exit
PB: predicated region body
PF: predicated region fallthrough
CT: control target
= control target key end

     0   :  { %s798_s12 = smov 0   ;;  %s878_s0 = inlined_call_operand.vmem [shape: f32[2,4,256], index: 0, kind: input, shape index: {}]   ;;  %s879_s1 = inlined_call_operand.vmem [shape: f32[2,64,4], index: 1, kind: input, shape index: {}]   ;;  %s880_s2 = inlined_call_operand.vmem [shape: f32[2,32,64], index: 2, kind: input, shape index: {}]   ;;  %s881_s3 = inlined_call_operand.vmem [shape: f32[2,32,256], index: 3, kind: output, shape index: {}]  }
   0x1 LB: > { %s678_s13 = sadd.s32 4294967295, %s775_s12   ;;  %p682_p0 = scmp.ge.s32.totalorder %s775_s12, 1  ;;  %s775_s12 = sphi %s798_s12, %s13_s12  }
   0x2   : > { %p157_p1 = scmp.lt.s32.totalorder %s775_s12, 3 }
   0x4   : > { %p158_p2 = pnand %p682_p0, %p157_p1 }
   0x5   : > { %p191_p3 = scmp.lt.s32.totalorder (!%p158_p2), %s678_s13, 1 }
   0x6   : > { %161 = sbr.rel (%p158_p2) target bundleno = 783 (0x30f), region = 32 }
   0xb   : > { %v777_v0 = vmov 0.0   ;;  %s883_s13 = smov (!%p191_p3, %s678_s13), 1  ;;  %vm251_vm0 = vcmask 1043456   ;;  %vm226_vm1 = vcmask 31744   ;;  %vm489_vm2 = vcmask 523264  }
   0xc   : > { %320 = vmatprep.mubr.f32.mxu0 %v777_v0  ;;  %566 = vmatprep.mubr.f32.mxu1 %v777_v0  ;;  %s707_s14 = sshll.u32 %s883_s13, 3  ;;  %s708_s15 = sshll.u32 %s883_s13, 6 }
   0xd   : > { %s195_s18 = scalar_lea.vmem %s878_s0, %s707_s14  ;;  %s200_s21 = scalar_lea.vmem %s879_s1, %s708_s15 }
   0xe   : > { %v211_v1 = vld [vmem:[%s195_s18] sm:$0xff]  ;;  %v213_v4 = vld [vmem:[%s200_s21 + $0x8] sm:$0xff]  ;;  %v214_v5 = vld [vmem:[%s200_s21 + $0x10] sm:$0xff]  ;;  %s709_s22 = sshll.u32 %s883_s13, 5  ;;  %s210_s28 = scalar_lea.vmem %s881_s3, %s708_s15 }
   0xf   : > { %v225_v2 = vcombine.high %v211_v1, %v211_v1  ;;  %v212_v3 = vld [vmem:[%s200_s21] sm:$0xff]  ;;  %v215_v6 = vld [vmem:[%s200_s21 + $0x18] sm:$0xff]  ;;  %v217_v8 = vld [vmem:[%s200_s21 + $0x28] sm:$0xff]  ;;  %s205_s25 = scalar_lea.vmem %s880_s2, %s709_s22 }
  0x10   : > { %v216_v7 = vld [vmem:[%s200_s21 + $0x20] sm:$0xff]  ;;  %v218_v9 = vld [vmem:[%s200_s21 + $0x30] sm:$0xff]  ;;  %v219_v10 = vld [vmem:[%s200_s21 + $0x38] sm:$0xff] }
  0x11   : > { %691 = vmatprep.subr.msk.mxu0 %vm251_vm0, %v225_v2 }
  0x12   : > { %692 = vmatpush1.msk.msra.mxu0 %vm251_vm0, %v211_v1 }
  0x13   : > { %693 = vmatmul.mubr.msk.f32.vlgmr.msra.gmra.mxu0 %vm226_vm1, %v212_v3 }
  0x14   : > { %326 = vmatprep.mubr.f32.mxu0 %v777_v0 }
  0x17   : > { %694 = vmatmul.mubr.msk.f32.gmra.mxu0 %vm226_vm1, %v213_v4 }
  0x18   : > { %332 = vmatprep.mubr.f32.mxu0 %v777_v0 }
  0x1b   : > { %695 = vmatmul.mubr.msk.f32.gmra.mxu0 %vm226_vm1, %v214_v5 }
  0x1c   : > { %338 = vmatprep.mubr.f32.mxu0 %v777_v0 }
  0x1f   : > { %696 = vmatmul.mubr.msk.f32.gmra.mxu0 %vm226_vm1, %v215_v6 }
  0x20   : > { %344 = vmatprep.mubr.f32.mxu0 %v777_v0 }
  0x23   : > { %697 = vmatmul.mubr.msk.f32.gmra.mxu0 %vm226_vm1, %v216_v7 }
  0x24   : > { %350 = vmatprep.mubr.f32.mxu0 %v777_v0 }
  0x27   : > { %698 = vmatmul.mubr.msk.f32.gmra.mxu0 %vm226_vm1, %v217_v8 }
  0x28   : > { %356 = vmatprep.mubr.f32.mxu0 %v777_v0 }
  0x2b   : > { %699 = vmatmul.mubr.msk.f32.gmra.mxu0 %vm226_vm1, %v218_v9 }
  0x2c   : > { %362 = vmatprep.mubr.f32.mxu0 %v777_v0 }
  0x2f   : > { %700 = vmatmul.mubr.msk.f32.gmra.mxu0 %vm226_vm1, %v219_v10 }
  0xd3   : > { %v835_v11 = vpop.f32.mrf.mxu0 }
  0xd5   : > { %v837_v12 = vpop.f32.mrf.mxu0 }
  0xd6   : > { %v369_v31 = vmax.f32 %v835_v11, %v837_v12 }
  0xd7   : > { %v839_v13 = vpop.f32.mrf.mxu0 }
  0xd9   : > { %v841_v14 = vpop.f32.mrf.mxu0 }
  0xda   : > { %v372_v34 = vmax.f32 %v839_v13, %v841_v14 }
  0xdb   : > { %v334_v15 = vpop.f32.mrf.mxu0 }
  0xdd   : > { %v843_v16 = vpop.f32.mrf.mxu0 }
  0xde   : > { %v375_v29 = vmax.f32 %v334_v15, %v843_v16 }
  0xdf   : > { %v340_v17 = vpop.f32.mrf.mxu0 }
  0xe1   : > { %v342_v18 = vpop.f32.mrf.mxu0 }
  0xe2   : > { %v378_v33 = vmax.f32 %v340_v17, %v342_v18 }
  0xe3   : > { %v346_v19 = vpop.f32.mrf.mxu0 }
  0xe5   : > { %v348_v20 = vpop.f32.mrf.mxu0 }
  0xe6   : > { %v381_v26 = vmax.f32 %v346_v19, %v348_v20 }
  0xe7   : > { %v352_v21 = vpop.f32.mrf.mxu0 }
  0xe9   : > { %v354_v22 = vpop.f32.mrf.mxu0 }
  0xea   : > { %v384_v23 = vmax.f32 %v352_v21, %v354_v22 }
  0xeb   : > { %v358_v24 = vpop.f32.mrf.mxu0 }
  0xec   : > { %385 = vmax.xlane.f32.xlu1 %v384_v23 }
  0xed   : > { %v360_v25 = vpop.f32.mrf.mxu0 }
  0xee   : > { %v387_v32 = vmax.f32 %v358_v24, %v360_v25 }
  0xef   : > { %v364_v27 = vpop.f32.mrf.mxu0 }
  0xf0   : > { %382 = vmax.xlane.f32.xlu1 %v381_v26 }
  0xf1   : > { %v366_v28 = vpop.f32.mrf.mxu0 }
  0xf2   : > { %v390_v30 = vmax.f32 %v364_v27, %v366_v28 }
  0xf4   : > { %376 = vmax.xlane.f32.xlu1 %v375_v29  ;;  %391 = vmax.xlane.f32.xlu0 %v390_v30 }
  0xf8   : > { %370 = vmax.xlane.f32.xlu1 %v369_v31  ;;  %388 = vmax.xlane.f32.xlu0 %v387_v32 }
  0xfc   : > { %379 = vmax.xlane.f32.xlu0 %v378_v33 }
 0x100   : > { %373 = vmax.xlane.f32.xlu0 %v372_v34 }
 0x175   : > { %v386_v35 = vpop.xlane.xlu1 %385 }
 0x176   : > { %v403_v36 = vsub.f32 %v352_v21, %v386_v35  ;;  %v404_v37 = vsub.f32 %v354_v22, %v386_v35 }
 0x178   : > { %v429_v40 = vmul.f32 1.442695, %v403_v36  ;;  %v431_v43 = vmul.f32 1.442695, %v404_v37 }
 0x179   : > { %v383_v38 = vpop.xlane.xlu1 %382 }
 0x17a   : > { %v401_v41 = vsub.f32 %v346_v19, %v383_v38  ;;  %v402_v44 = vsub.f32 %v348_v20, %v383_v38  ;;  %721 = vpow2.f32 %v429_v40 }
 0x17b   : > { %723 = vpow2.f32 %v431_v43 }
 0x17c   : > { %v425_v50 = vmul.f32 1.442695, %v401_v41  ;;  %v427_v52 = vmul.f32 1.442695, %v402_v44 }
 0x17d   : > { %v392_v39 = vpop.xlane.xlu0 %391  ;;  %v377_v47 = vpop.xlane.xlu1 %376 }
 0x17e   : > { %v407_v42 = vsub.f32 %v364_v27, %v392_v39  ;;  %v408_v45 = vsub.f32 %v366_v28, %v392_v39  ;;  %v397_v54 = vsub.f32 %v334_v15, %v377_v47  ;;  %v398_v56 = vsub.f32 %v843_v16, %v377_v47 }
 0x180   : > { %v437_v46 = vmul.f32 1.442695, %v407_v42  ;;  %v439_v48 = vmul.f32 1.442695, %v408_v45  ;;  %v417_v62 = vmul.f32 1.442695, %v397_v54 }
 0x181   : > { %v389_v49 = vpop.xlane.xlu0 %388  ;;  %v371_v61 = vpop.xlane.xlu1 %370  ;;  %v419_v2 = vmul.f32 1.442695, %v398_v56 }
 0x182   : > { %v405_v51 = vsub.f32 %v358_v24, %v389_v49  ;;  %v406_v53 = vsub.f32 %v360_v25, %v389_v49  ;;  %725 = vpow2.f32 %v437_v46  ;;  %v393_v4 = vsub.f32 %v835_v11, %v371_v61 }
 0x183   : > { %727 = vpow2.f32 %v439_v48  ;;  %v394_v7 = vsub.f32 %v837_v12, %v371_v61 }
 0x184   : > { %v433_v55 = vmul.f32 1.442695, %v405_v51  ;;  %v435_v57 = vmul.f32 1.442695, %v406_v53  ;;  %729 = vpow2.f32 %v425_v50  ;;  %v409_v10 = vmul.f32 1.442695, %v393_v4 }
 0x185   : > { %v380_v58 = vpop.xlane.xlu0 %379  ;;  %731 = vpow2.f32 %v427_v52  ;;  %v411_v16 = vmul.f32 1.442695, %v394_v7  ;;  %v222_v7 = vld [vmem:[%s205_s25 + $0x10] sm:$0xff] }
 0x186   : > { %v399_v59 = vsub.f32 %v340_v17, %v380_v58  ;;  %v400_v60 = vsub.f32 %v342_v18, %v380_v58  ;;  %733 = vpow2.f32 %v433_v55 }
 0x187   : > { %735 = vpow2.f32 %v435_v57  ;;  %v855_v15 = vpop.eup %721 }
 0x188   : > { %v421_v63 = vmul.f32 1.442695, %v399_v59  ;;  %v423_v1 = vmul.f32 1.442695, %v400_v60  ;;  %v724_v17 = vpop.eup %723 }
 0x189   : > { %v374_v3 = vpop.xlane.xlu0 %373  ;;  %v456_v22 = vadd.f32 %v724_v17, %v855_v15 }
 0x18a   : > { %737 = vpow2.f32 %v421_v63  ;;  %v395_v5 = vsub.f32 %v839_v13, %v374_v3  ;;  %v396_v6 = vsub.f32 %v841_v14, %v374_v3 }
 0x18b   : > { %739 = vpow2.f32 %v423_v1 }
 0x18c   : > { %741 = vpow2.f32 %v417_v62  ;;  %v413_v8 = vmul.f32 1.442695, %v395_v5  ;;  %v415_v9 = vmul.f32 1.442695, %v396_v6  ;;  %v220_v5 = vld [vmem:[%s205_s25] sm:$0xff]  ;;  %v221_v6 = vld [vmem:[%s205_s25 + $0x8] sm:$0xff] }
 0x18d   : > { %743 = vpow2.f32 %v419_v2 }
 0x18e   : > { %745 = vpow2.f32 %v413_v8  ;;  %v223_v8 = vld [vmem:[%s205_s25 + $0x18] sm:$0xff] }
 0x18f   : > { %747 = vpow2.f32 %v415_v9  ;;  %v726_v11 = vpop.eup %725 }
 0x190   : > { %v728_v18 = vpop.eup %727  ;;  %749 = vpow2.f32 %v409_v10 }
 0x191   : > { %v730_v13 = vpop.eup %729  ;;  %751 = vpow2.f32 %v411_v16  ;;  %v462_v14 = vadd.f32 %v728_v18, %v726_v11 }
 0x192   : > { %v732_v19 = vpop.eup %731 }
 0x193   : > { %v734_v12 = vpop.eup %733  ;;  %463 = vadd.xlane.f32.xlu0 %v462_v14  ;;  %v453_v29 = vadd.f32 %v732_v19, %v730_v13 }
 0x194   : > { %v736_v20 = vpop.eup %735 }
 0x195   : > { %v459_v23 = vadd.f32 %v736_v20, %v734_v12 }
 0x197   : > { %v738_v21 = vpop.eup %737  ;;  %457 = vadd.xlane.f32.xlu0 %v456_v22  ;;  %460 = vadd.xlane.f32.xlu1 %v459_v23 }
 0x198   : > { %v740_v24 = vpop.eup %739 }
 0x199   : > { %v742_v25 = vpop.eup %741  ;;  %v450_v26 = vadd.f32 %v740_v24, %v738_v21 }
 0x19a   : > { %v744_v27 = vpop.eup %743 }
 0x19b   : > { %v858_v28 = vpop.eup %745  ;;  %454 = vadd.xlane.f32.xlu1 %v453_v29  ;;  %451 = vadd.xlane.f32.xlu0 %v450_v26  ;;  %v447_v33 = vadd.f32 %v744_v27, %v742_v25 }
 0x19c   : > { %v748_v30 = vpop.eup %747 }
 0x19d   : > { %v444_v31 = vadd.f32 %v748_v30, %v858_v28  ;;  %v750_v32 = vpop.eup %749 }
 0x19e   : > { %v752_v34 = vpop.eup %751 }
 0x19f   : > { %448 = vadd.xlane.f32.xlu1 %v447_v33  ;;  %445 = vadd.xlane.f32.xlu0 %v444_v31  ;;  %v441_v35 = vadd.f32 %v752_v34, %v750_v32 }
 0x1a3   : > { %442 = vadd.xlane.f32.xlu1 %v441_v35 }
 0x21c   : > { %v464_v36 = vpop.xlane.xlu0 %463 }
 0x21d   : > { %753 = vrcp.f32 %v464_v36 }
 0x220   : > { %v461_v37 = vpop.xlane.xlu1 %460  ;;  %v458_v38 = vpop.xlane.xlu0 %457 }
 0x221   : > { %755 = vrcp.f32 %v461_v37 }
 0x222   : > { %757 = vrcp.f32 %v458_v38 }
 0x224   : > { %v455_v39 = vpop.xlane.xlu1 %454  ;;  %v452_v40 = vpop.xlane.xlu0 %451 }
 0x225   : > { %759 = vrcp.f32 %v455_v39 }
 0x226   : > { %761 = vrcp.f32 %v452_v40 }
 0x228   : > { %v449_v41 = vpop.xlane.xlu1 %448  ;;  %v446_v42 = vpop.xlane.xlu0 %445 }
 0x229   : > { %763 = vrcp.f32 %v449_v41 }
 0x22a   : > { %v754_v43 = vpop.eup %753  ;;  %765 = vrcp.f32 %v446_v42 }
 0x22b   : > { %v488_v44 = vmul.f32 %v754_v43, %v728_v18  ;;  %v487_v45 = vmul.f32 %v754_v43, %v726_v11 }
 0x22c   : > { %v443_v46 = vpop.xlane.xlu1 %442 }
 0x22d   : > { %767 = vrcp.f32 %v443_v46  ;;  %518 = vmatprep.subr.mxu1 %v488_v44 }
 0x22e   : > { %v756_v47 = vpop.eup %755  ;;  %519 = vmatpush1.msra.mxu1 %v487_v45 }
 0x22f   : > { %v758_v48 = vpop.eup %757  ;;  %v485_v49 = vmul.f32 %v756_v47, %v736_v20  ;;  %v484_v50 = vmul.f32 %v756_v47, %v734_v12 }
 0x230   : > { %v482_v51 = vmul.f32 %v758_v48, %v724_v17  ;;  %v481_v53 = vmul.f32 %v758_v48, %v855_v15 }
 0x231   : > { %520 = vmatprep.subr.mxu1 %v485_v49 }
 0x232   : > { %v760_v52 = vpop.eup %759  ;;  %521 = vmatpush1.msra.mxu1 %v484_v50 }
 0x233   : > { %v762_v54 = vpop.eup %761  ;;  %522 = vmatprep.subr.mxu1 %v482_v51  ;;  %v479_v55 = vmul.f32 %v760_v52, %v732_v19  ;;  %v478_v56 = vmul.f32 %v760_v52, %v730_v13 }
 0x234   : > { %523 = vmatpush1.msra.mxu1 %v481_v53  ;;  %v476_v57 = vmul.f32 %v762_v54, %v740_v24  ;;  %v475_v59 = vmul.f32 %v762_v54, %v738_v21 }
 0x235   : > { %524 = vmatprep.subr.mxu1 %v479_v55 }
 0x236   : > { %v764_v58 = vpop.eup %763  ;;  %525 = vmatpush1.msra.mxu1 %v478_v56 }
 0x237   : > { %v766_v60 = vpop.eup %765  ;;  %526 = vmatprep.subr.mxu1 %v476_v57  ;;  %v473_v61 = vmul.f32 %v764_v58, %v744_v27  ;;  %v472_v62 = vmul.f32 %v764_v58, %v742_v25 }
 0x238   : > { %527 = vmatpush1.msra.mxu1 %v475_v59  ;;  %v470_v63 = vmul.f32 %v766_v60, %v748_v30  ;;  %v469_v2 = vmul.f32 %v766_v60, %v858_v28 }
 0x239   : > { %528 = vmatprep.subr.mxu1 %v473_v61 }
 0x23a   : > { %v768_v1 = vpop.eup %767  ;;  %529 = vmatpush1.msra.mxu1 %v472_v62 }
 0x23b   : > { %530 = vmatprep.subr.mxu1 %v470_v63  ;;  %v467_v3 = vmul.f32 %v768_v1, %v752_v34  ;;  %v466_v4 = vmul.f32 %v768_v1, %v750_v32 }
 0x23c   : > { %531 = vmatpush1.msra.mxu1 %v469_v2 }
 0x23d   : > { %532 = vmatprep.subr.mxu1 %v467_v3 }
 0x23e   : > { %533 = vmatpush1.msra.mxu1 %v466_v4 }
 0x23f   : > { %701 = vmatmul.mubr.msk.f32.vlgmr.msra.gmra.mxu1 %vm489_vm2, %v220_v5 }
 0x240   : > { %572 = vmatprep.mubr.f32.mxu1 %v777_v0 }
 0x243   : > { %702 = vmatmul.mubr.msk.f32.gmra.mxu1 %vm489_vm2, %v221_v6 }
 0x244   : > { %578 = vmatprep.mubr.f32.mxu1 %v777_v0 }
 0x247   : > { %703 = vmatmul.mubr.msk.f32.gmra.mxu1 %vm489_vm2, %v222_v7 }
 0x248   : > { %584 = vmatprep.mubr.f32.mxu1 %v777_v0 }
 0x24b   : > { %704 = vmatmul.mubr.msk.f32.gmra.mxu1 %vm489_vm2, %v223_v8 }
 0x2ff   : > { %v568_v9 = vpop.f32.mrf.mxu1 }
 0x300   : > { %591 = vst [vmem:[%s210_s28] sm:$0xff] %v568_v9 }
 0x301   : > { %v570_v10 = vpop.f32.mrf.mxu1 }
 0x302   : > { %592 = vst [vmem:[%s210_s28 + $0x8] sm:$0xff] %v570_v10 }
 0x303   : > { %v574_v15 = vpop.f32.mrf.mxu1 }
 0x304   : > { %593 = vst [vmem:[%s210_s28 + $0x10] sm:$0xff] %v574_v15 }
 0x305   : > { %v576_v16 = vpop.f32.mrf.mxu1 }
 0x306   : > { %594 = vst [vmem:[%s210_s28 + $0x18] sm:$0xff] %v576_v16 }
 0x307   : > { %v580_v17 = vpop.f32.mrf.mxu1 }
 0x308   : > { %595 = vst [vmem:[%s210_s28 + $0x20] sm:$0xff] %v580_v17 }
 0x309   : > { %v582_v11 = vpop.f32.mrf.mxu1 }
 0x30a   : > { %596 = vst [vmem:[%s210_s28 + $0x28] sm:$0xff] %v582_v11 }
 0x30b   : > { %v586_v0 = vpop.f32.mrf.mxu1 }
 0x30c   : > { %597 = vst [vmem:[%s210_s28 + $0x30] sm:$0xff] %v586_v0 }
 0x30d   : > { %v588_v18 = vpop.f32.mrf.mxu1 }
 0x30e   : > { %598 = vst [vmem:[%s210_s28 + $0x38] sm:$0xff] %v588_v18 }
 0x30f PF: > { %s13_s12 = sadd.s32 1, %s775_s12  }
 0x310   : > { %p10_p4 = scmp.ge.s32.totalorder %s13_s12, 4  }
 0x312   :  { %12 = sbr.rel (!%p10_p4) target bundleno = 1 (0x1), region = 68 }

// kernel: hsa_forward.8
= control target key start
LH: loop header
LB: loop body
LE: loop exit
PB: predicated region body
PF: predicated region fallthrough
CT: control target
= control target key end

     0   :  { %s582_s12 = smov 0   ;;  %s626_s0 = inlined_call_operand.vmem [shape: f32[2,4,256], index: 0, kind: input, shape index: {}]   ;;  %s627_s1 = inlined_call_operand.vmem [shape: f32[2,4,4], index: 1, kind: input, shape index: {}]   ;;  %s628_s2 = inlined_call_operand.vmem [shape: f32[2,32,4], index: 2, kind: input, shape index: {}]   ;;  %s629_s3 = inlined_call_operand.vmem [shape: f32[2,32,256], index: 3, kind: output, shape index: {}]  }
   0x1 LB: > { %s509_s13 = sadd.s32 4294967295, %s559_s12   ;;  %p513_p0 = scmp.ge.s32.totalorder %s559_s12, 1  ;;  %s559_s12 = sphi %s582_s12, %s13_s12  }
   0x2   : > { %p156_p1 = scmp.lt.s32.totalorder %s559_s12, 3 }
   0x4   : > { %p157_p2 = pnand %p513_p0, %p156_p1 }
   0x5   : > { %p189_p3 = scmp.lt.s32.totalorder (!%p157_p2), %s509_s13, 1 }
   0x6   : > { %160 = sbr.rel (%p157_p2) target bundleno = 737 (0x2e1), region = 32 }
   0xb   : > { %v561_v0 = vmov 0.0   ;;  %s631_s13 = smov (!%p189_p3, %s509_s13), 1  ;;  %vm220_vm0 = vcmask 1043456   ;;  %vm216_vm1 = vcmask 31744  }
   0xc   : > { %289 = vmatprep.mubr.f32.mxu0 %v561_v0  ;;  %403 = vmatprep.mubr.f32.mxu1 %v561_v0  ;;  %s532_s14 = sshll.u32 %s631_s13, 3  ;;  %s516_s15 = sshll.u32 %s631_s13, 2 }
   0xd   : > { %s193_s18 = scalar_lea.vmem %s626_s0, %s532_s14  ;;  %s197_s21 = scalar_lea.vmem %s627_s1, %s516_s15 }
   0xe   : > { %v208_v1 = vld [vmem:[%s193_s18] sm:$0xff]  ;;  %s533_s22 = sshll.u32 %s631_s13, 5  ;;  %s534_s26 = sshll.u32 %s631_s13, 6 }
   0xf   : > { %v215_v2 = vcombine.high %v208_v1, %v208_v1  ;;  %v209_v3 = vld [vmem:[%s197_s21] sm:$0xf]  ;;  %s202_s25 = scalar_lea.vmem %s628_s2, %s533_s22  ;;  %s207_s29 = scalar_lea.vmem %s629_s3, %s534_s26 }
  0x10   : > { %v211_v23 = vld [vmem:[%s202_s25 + $0x8] sm:$0xff]  ;;  %v210_v24 = vld [vmem:[%s202_s25] sm:$0xff]  ;;  %v212_v25 = vld [vmem:[%s202_s25 + $0x10] sm:$0xff] }
  0x11   : > { %521 = vmatprep.subr.msk.mxu0 %vm220_vm0, %v215_v2  ;;  %v213_v26 = vld [vmem:[%s202_s25 + $0x18] sm:$0xff] }
  0x12   : > { %522 = vmatpush1.msk.msra.mxu0 %vm220_vm0, %v208_v1 }
  0x13   : > { %523 = vmatmul.mubr.msk.f32.vlgmr.msra.gmra.mxu0 %vm216_vm1, %v209_v3 }
  0x14   : > { %397 = vmatprep.mubr.f32.mxu0 %v561_v0 }
  0xd3   : > { %v291_v4 = vpop.f32.mrf.mxu0 }
  0xd4   : > { %v296_v6 = vsel %vm220_vm0, %v291_v4, -inf }
  0xd5   : > { %v293_v5 = vpop.f32.mrf.mxu0 }
  0xd6   : > { %v297_v7 = vsel %vm220_vm0, %v293_v5, -inf }
  0xd7   : > { %v298_v8 = vmax.f32 %v296_v6, %v297_v7 }
  0xd9   : > { %299 = vmax.xlane.f32.xlu0 %v298_v8 }
 0x162   : > { %v300_v9 = vpop.xlane.xlu0 %299 }
 0x163   : > { %v301_v10 = vsub.f32 %v291_v4, %v300_v9  ;;  %v302_v11 = vsub.f32 %v293_v5, %v300_v9 }
 0x165   : > { %v303_v12 = vmul.f32 1.442695, %v301_v10  ;;  %v305_v13 = vmul.f32 1.442695, %v302_v11 }
 0x167   : > { %547 = vpow2.f32 %v303_v12 }
 0x168   : > { %549 = vpow2.f32 %v305_v13 }
 0x174   : > { %v548_v14 = vpop.eup %547 }
 0x175   : > { %v550_v15 = vpop.eup %549  ;;  %v307_v16 = vsel %vm220_vm0, %v548_v14, 0.0 }
 0x176   : > { %v308_v17 = vsel %vm220_vm0, %v550_v15, 0.0 }
 0x177   : > { %v309_v18 = vadd.f32 %v308_v17, %v307_v16 }
 0x179   : > { %310 = vadd.xlane.f32.xlu0 %v309_v18 }
 0x202   : > { %v311_v19 = vpop.xlane.xlu0 %310 }
 0x203   : > { %551 = vrcp.f32 %v311_v19 }
 0x210   : > { %v552_v20 = vpop.eup %551 }
 0x211   : > { %v314_v21 = vmul.f32 %v552_v20, %v550_v15  ;;  %v313_v22 = vmul.f32 %v552_v20, %v548_v14 }
 0x213   : > { %524 = vmatprep.subr.msk.mxu0 %vm220_vm0, %v314_v21  ;;  %535 = vmatprep.subr.msk.mxu1 %vm220_vm0, %v314_v21 }
 0x214   : > { %525 = vmatpush1.msk.msra.mxu0 %vm220_vm0, %v313_v22  ;;  %536 = vmatpush1.msk.msra.mxu1 %vm220_vm0, %v313_v22 }
 0x215   : > { %527 = vmatmul.mubr.msk.f32.vlgmr.msra.gmra.mxu1 %vm216_vm1, %v211_v23  ;;  %526 = vmatmul.mubr.msk.f32.vlgmr.msra.gmra.mxu0 %vm216_vm1, %v210_v24 }
 0x216   : > { %409 = vmatprep.mubr.f32.mxu1 %v561_v0 }
 0x219   : > { %528 = vmatmul.mubr.msk.f32.gmra.mxu1 %vm216_vm1, %v212_v25 }
 0x21a   : > { %415 = vmatprep.mubr.f32.mxu1 %v561_v0 }
 0x21d   : > { %529 = vmatmul.mubr.msk.f32.gmra.mxu1 %vm216_vm1, %v213_v26 }
 0x2d5   : > { %v405_v27 = vpop.f32.mrf.mxu1  ;;  %v399_v28 = vpop.f32.mrf.mxu0 }
 0x2d6   : > { %424 = vst [vmem:[%s207_s29 + $0x10] sm:$0xff] %v405_v27  ;;  %422 = vst [vmem:[%s207_s29] sm:$0xff] %v399_v28 }
 0x2d7   : > { %v407_v29 = vpop.f32.mrf.mxu1  ;;  %v401_v30 = vpop.f32.mrf.mxu0 }
 0x2d8   : > { %425 = vst [vmem:[%s207_s29 + $0x18] sm:$0xff] %v407_v29  ;;  %423 = vst [vmem:[%s207_s29 + $0x8] sm:$0xff] %v401_v30 }
 0x2d9   : > { %v411_v31 = vpop.f32.mrf.mxu1 }
 0x2da   : > { %426 = vst [vmem:[%s207_s29 + $0x20] sm:$0xff] %v411_v31 }
 0x2db   : > { %v413_v32 = vpop.f32.mrf.mxu1 }
 0x2dc   : > { %427 = vst [vmem:[%s207_s29 + $0x28] sm:$0xff] %v413_v32 }
 0x2dd   : > { %v417_v33 = vpop.f32.mrf.mxu1 }
 0x2de   : > { %428 = vst [vmem:[%s207_s29 + $0x30] sm:$0xff] %v417_v33 }
 0x2df   : > { %v419_v34 = vpop.f32.mrf.mxu1 }
 0x2e0   : > { %429 = vst [vmem:[%s207_s29 + $0x38] sm:$0xff] %v419_v34 }
 0x2e1 PF: > { %s13_s12 = sadd.s32 1, %s559_s12  }
 0x2e2   : > { %p10_p4 = scmp.ge.s32.totalorder %s13_s12, 4  }
 0x2e4   :  { %12 = sbr.rel (!%p10_p4) target bundleno = 1 (0x1), region = 68 }

// kernel: hsa_forward.7
= control target key start
LH: loop header
LB: loop body
LE: loop exit
PB: predicated region body
PF: predicated region fallthrough
CT: control target
= control target key end

     0   :  { %s610_s12 = smov 0   ;;  %s645_s0 = inlined_call_operand.vmem [shape: f32[2,4,256], index: 0, kind: input, shape index: {}]   ;;  %s646_s1 = inlined_call_operand.vmem [shape: f32[2,16,4], index: 1, kind: input, shape index: {}]   ;;  %s647_s2 = inlined_call_operand.vmem [shape: f32[2,32,16], index: 2, kind: input, shape index: {}]   ;;  %s648_s3 = inlined_call_operand.vmem [shape: f32[2,32,256], index: 3, kind: output, shape index: {}]  }
   0x1 LB: > { %s528_s13 = sadd.s32 4294967295, %s587_s12   ;;  %p532_p0 = scmp.ge.s32.totalorder %s587_s12, 1  ;;  %s587_s12 = sphi %s610_s12, %s13_s12  }
   0x2   : > { %p157_p1 = scmp.lt.s32.totalorder %s587_s12, 3 }
   0x4   : > { %p158_p2 = pnand %p532_p0, %p157_p1 }
   0x5   : > { %p191_p3 = scmp.lt.s32.totalorder (!%p158_p2), %s528_s13, 1 }
   0x6   : > { %161 = sbr.rel (%p158_p2) target bundleno = 743 (0x2e7), region = 32 }
   0xb   : > { %v589_v0 = vmov 0.0   ;;  %s650_s13 = smov (!%p191_p3, %s528_s13), 1  ;;  %vm227_vm0 = vcmask 1043456   ;;  %vm220_vm1 = vcmask 31744   ;;  %vm339_vm2 = vcmask 130048  }
   0xc   : > { %296 = vmatprep.mubr.f32.mxu0 %v589_v0  ;;  %422 = vmatprep.mubr.f32.mxu1 %v589_v0  ;;  %s551_s14 = sshll.u32 %s650_s13, 3  ;;  %s552_s15 = sshll.u32 %s650_s13, 4 }
   0xd   : > { %s195_s18 = scalar_lea.vmem %s645_s0, %s551_s14  ;;  %s200_s21 = scalar_lea.vmem %s646_s1, %s552_s15 }
   0xe   : > { %v211_v1 = vld [vmem:[%s195_s18] sm:$0xff]  ;;  %v213_v4 = vld [vmem:[%s200_s21 + $0x8] sm:$0xff]  ;;  %s553_s22 = sshll.u32 %s650_s13, 5  ;;  %s554_s26 = sshll.u32 %s650_s13, 6 }
   0xf   : > { %v219_v2 = vcombine.high %v211_v1, %v211_v1  ;;  %v212_v3 = vld [vmem:[%s200_s21] sm:$0xff]  ;;  %s205_s25 = scalar_lea.vmem %s647_s2, %s553_s22  ;;  %s210_s29 = scalar_lea.vmem %s648_s3, %s554_s26 }
  0x10   : > { %v215_v35 = vld [vmem:[%s205_s25 + $0x8] sm:$0xff]  ;;  %v214_v36 = vld [vmem:[%s205_s25] sm:$0xff]  ;;  %v216_v37 = vld [vmem:[%s205_s25 + $0x10] sm:$0xff] }
  0x11   : > { %541 = vmatprep.subr.msk.mxu0 %vm227_vm0, %v219_v2  ;;  %v217_v38 = vld [vmem:[%s205_s25 + $0x18] sm:$0xff] }
  0x12   : > { %542 = vmatpush1.msk.msra.mxu0 %vm227_vm0, %v211_v1 }
  0x13   : > { %543 = vmatmul.mubr.msk.f32.vlgmr.msra.gmra.mxu0 %vm220_vm1, %v212_v3 }
  0x14   : > { %302 = vmatprep.mubr.f32.mxu0 %v589_v0 }
  0x17   : > { %544 = vmatmul.mubr.msk.f32.gmra.mxu0 %vm220_vm1, %v213_v4 }
  0x18   : > { %416 = vmatprep.mubr.f32.mxu0 %v589_v0 }
  0xd3   : > { %v298_v5 = vpop.f32.mrf.mxu0 }
  0xd5   : > { %v300_v6 = vpop.f32.mrf.mxu0 }
  0xd6   : > { %v309_v10 = vmax.f32 %v298_v5, %v300_v6 }
  0xd7   : > { %v304_v7 = vpop.f32.mrf.mxu0 }
  0xd9   : > { %v306_v8 = vpop.f32.mrf.mxu0 }
  0xda   : > { %v312_v9 = vmax.f32 %v304_v7, %v306_v8 }
  0xdc   : > { %313 = vmax.xlane.f32.xlu0 %v312_v9 }
  0xe0   : > { %310 = vmax.xlane.f32.xlu0 %v309_v10 }
 0x165   : > { %v314_v11 = vpop.xlane.xlu0 %313 }
 0x166   : > { %v317_v12 = vsub.f32 %v304_v7, %v314_v11  ;;  %v318_v13 = vsub.f32 %v306_v8, %v314_v11 }
 0x168   : > { %v323_v14 = vmul.f32 1.442695, %v317_v12  ;;  %v325_v15 = vmul.f32 1.442695, %v318_v13 }
 0x169   : > { %v311_v16 = vpop.xlane.xlu0 %310 }
 0x16a   : > { %569 = vpow2.f32 %v323_v14  ;;  %v315_v17 = vsub.f32 %v298_v5, %v311_v16  ;;  %v316_v18 = vsub.f32 %v300_v6, %v311_v16 }
 0x16b   : > { %571 = vpow2.f32 %v325_v15 }
 0x16c   : > { %v319_v19 = vmul.f32 1.442695, %v315_v17  ;;  %v321_v20 = vmul.f32 1.442695, %v316_v18 }
 0x16e   : > { %573 = vpow2.f32 %v319_v19 }
 0x16f   : > { %575 = vpow2.f32 %v321_v20 }
 0x177   : > { %v570_v21 = vpop.eup %569 }
 0x178   : > { %v572_v22 = vpop.eup %571 }
 0x179   : > { %v330_v23 = vadd.f32 %v572_v22, %v570_v21 }
 0x17b   : > { %v574_v24 = vpop.eup %573  ;;  %331 = vadd.xlane.f32.xlu1 %v330_v23 }
 0x17c   : > { %v576_v25 = vpop.eup %575 }
 0x17d   : > { %v327_v26 = vadd.f32 %v576_v25, %v574_v24 }
 0x17f   : > { %328 = vadd.xlane.f32.xlu1 %v327_v26 }
 0x204   : > { %v332_v27 = vpop.xlane.xlu1 %331 }
 0x205   : > { %577 = vrcp.f32 %v332_v27 }
 0x208   : > { %v329_v28 = vpop.xlane.xlu1 %328 }
 0x209   : > { %579 = vrcp.f32 %v329_v28 }
 0x212   : > { %v578_v29 = vpop.eup %577 }
 0x213   : > { %v338_v30 = vmul.f32 %v578_v29, %v572_v22  ;;  %v337_v31 = vmul.f32 %v578_v29, %v570_v21 }
 0x215   : > { %380 = vmatprep.subr.mxu0 %v338_v30  ;;  %555 = vmatprep.subr.mxu1 %v338_v30 }
 0x216   : > { %v580_v32 = vpop.eup %579  ;;  %381 = vmatpush1.msra.mxu0 %v337_v31  ;;  %557 = vmatpush1.msra.mxu1 %v337_v31 }
 0x217   : > { %v335_v33 = vmul.f32 %v580_v32, %v576_v25  ;;  %v334_v34 = vmul.f32 %v580_v32, %v574_v24 }
 0x219   : > { %382 = vmatprep.subr.mxu0 %v335_v33  ;;  %556 = vmatprep.subr.mxu1 %v335_v33 }
 0x21a   : > { %383 = vmatpush1.msra.mxu0 %v334_v34  ;;  %558 = vmatpush1.msra.mxu1 %v334_v34 }
 0x21b   : > { %546 = vmatmul.mubr.msk.f32.vlgmr.msra.gmra.mxu1 %vm339_vm2, %v215_v35  ;;  %545 = vmatmul.mubr.msk.f32.vlgmr.msra.gmra.mxu0 %vm339_vm2, %v214_v36 }
 0x21c   : > { %428 = vmatprep.mubr.f32.mxu1 %v589_v0 }
 0x21f   : > { %547 = vmatmul.mubr.msk.f32.gmra.mxu1 %vm339_vm2, %v216_v37 }
 0x220   : > { %434 = vmatprep.mubr.f32.mxu1 %v589_v0 }
 0x223   : > { %548 = vmatmul.mubr.msk.f32.gmra.mxu1 %vm339_vm2, %v217_v38 }
 0x2db   : > { %v424_v39 = vpop.f32.mrf.mxu1  ;;  %v418_v40 = vpop.f32.mrf.mxu0 }
 0x2dc   : > { %443 = vst [vmem:[%s210_s29 + $0x10] sm:$0xff] %v424_v39  ;;  %441 = vst [vmem:[%s210_s29] sm:$0xff] %v418_v40 }
 0x2dd   : > { %v426_v41 = vpop.f32.mrf.mxu1  ;;  %v420_v42 = vpop.f32.mrf.mxu0 }
 0x2de   : > { %444 = vst [vmem:[%s210_s29 + $0x18] sm:$0xff] %v426_v41  ;;  %442 = vst [vmem:[%s210_s29 + $0x8] sm:$0xff] %v420_v42 }
 0x2df   : > { %v430_v43 = vpop.f32.mrf.mxu1 }
 0x2e0   : > { %445 = vst [vmem:[%s210_s29 + $0x20] sm:$0xff] %v430_v43 }
 0x2e1   : > { %v432_v44 = vpop.f32.mrf.mxu1 }
 0x2e2   : > { %446 = vst [vmem:[%s210_s29 + $0x28] sm:$0xff] %v432_v44 }
 0x2e3   : > { %v436_v45 = vpop.f32.mrf.mxu1 }
 0x2e4   : > { %447 = vst [vmem:[%s210_s29 + $0x30] sm:$0xff] %v436_v45 }
 0x2e5   : > { %v438_v46 = vpop.f32.mrf.mxu1 }
 0x2e6   : > { %448 = vst [vmem:[%s210_s29 + $0x38] sm:$0xff] %v438_v46 }
 0x2e7 PF: > { %s13_s12 = sadd.s32 1, %s587_s12  }
 0x2e8   : > { %p10_p4 = scmp.ge.s32.totalorder %s13_s12, 4  }
 0x2ea   :  { %12 = sbr.rel (!%p10_p4) target bundleno = 1 (0x1), region = 68 }

</bundles_post_ra>
